<compile_context>
chip_gen: v7x
topology: tpu7x:2x2x1
jax: 0.10.0
libtpu: 0.0.40
codegen_flags: <defaults>
</compile_context>

<pallas_src>
import math

import jax
import jax.numpy as jnp
from jax.experimental import pallas as pl
from jax.experimental.pallas import tpu as pltpu


# ---------------------------------------------------------------------------
# Fused kernel: patch-embed + transformer block + final LN + truncation
# ---------------------------------------------------------------------------
# Packed bias/gain rows (vecs_ref, shape [12, D]):
#   0 b_patch | 1 ln1_g | 2 ln1_b | 3 bq | 4 bk | 5 bv | 6 bo
#   7 ln2_g   | 8 ln2_b | 9 b2    | 10 lnf_g | 11 lnf_b
# Stacked attention weights (wqkvo_ref, shape [4, D, D]): 0 wq, 1 wk, 2 wv, 3 wo
def fused_vision_kernel(patches_ref, w_patch_ref, pos_ref, vecs_ref,
                        wqkvo_ref, w1_ref, b1_ref, w2_ref, out_ref):
    vecs = vecs_ref[...]                                        # [12, D], load once

    def vrow(i):                                                # [1, D] row
        return vecs[i:i + 1]

    def layer_norm(v, gi, bi, eps=1e-6):
        m = jnp.mean(v, axis=-1, keepdims=True)
        var = jnp.mean((v - m) ** 2, axis=-1, keepdims=True)
        return (v - m) * jax.lax.rsqrt(var + eps) * vrow(gi) + vrow(bi)

    # --- patch embedding (fused; the [N, D] embedding never leaves VMEM) ---
    p = patches_ref[0]                                          # [N, CPP]
    x = jnp.dot(p, w_patch_ref[...], preferred_element_type=jnp.float32)
    x = x + vrow(0) + pos_ref[...]                              # [N, D]

    # --- single-head self attention (pre-norm) ---
    h = layer_norm(x, 1, 2)
    q = jnp.dot(h, wqkvo_ref[0], preferred_element_type=jnp.float32) + vrow(3)
    k = jnp.dot(h, wqkvo_ref[1], preferred_element_type=jnp.float32) + vrow(4)
    v = jnp.dot(h, wqkvo_ref[2], preferred_element_type=jnp.float32) + vrow(5)

    scale = 1.0 / math.sqrt(x.shape[-1])
    # Contract the hidden axes directly — no materialized k.T.
    scores = jax.lax.dot_general(
        q, k, (((1,), (1,)), ((), ())),
        preferred_element_type=jnp.float32) * scale             # [N, N]
    scores = scores - jnp.max(scores, axis=-1, keepdims=True)
    pexp = jnp.exp(scores)
    attn = pexp * pl.reciprocal(jnp.sum(pexp, axis=-1, keepdims=True),
                                approx=True)

    ctx = jnp.dot(attn, v, preferred_element_type=jnp.float32)  # [N, D]
    x = x + jnp.dot(ctx, wqkvo_ref[3], preferred_element_type=jnp.float32) + vrow(6)

    # --- MLP (pre-norm) ---
    h2 = layer_norm(x, 7, 8)
    m1 = jnp.dot(h2, w1_ref[...], preferred_element_type=jnp.float32) + b1_ref[...]
    m1 = jax.nn.gelu(m1, approximate=True)
    x = x + jnp.dot(m1, w2_ref[...], preferred_element_type=jnp.float32) + vrow(9)

    # --- final LayerNorm on the kept rows only (in-kernel max_seq truncation) ---
    keep = out_ref.shape[1]                                     # static
    xk = layer_norm(x[:keep], 10, 11)                           # [max_seq, D]
    out_ref[0] = xk.astype(out_ref.dtype)


# ---------------------------------------------------------------------------
# Wrapper
# ---------------------------------------------------------------------------
def extract_patches(pixels, patch):
    """NCHW pixels -> [B, N, C*P*P] flattened non-overlapping patches.

    XLA glue (negligible at these sizes); for large images this patchify
    could be expressed through the BlockSpec index_map instead.
    """
    B, C, H, W = pixels.shape
    x = pixels.reshape(B, C, H // patch, patch, W // patch, patch)
    x = x.transpose(0, 2, 4, 1, 3, 5)                 # [B, Hp, Wp, C, P, P]
    return x.reshape(B, (H // patch) * (W // patch), C * patch * patch)


def vision_pixel_embedding(pixels, params, patch, max_seq):
    B, C, H, W = pixels.shape
    N = (H // patch) * (W // patch)
    CPP = C * patch * patch
    D = params["w_patch"].shape[1]
    Dm = params["w1"].shape[1]
    S = N if max_seq is None else min(max_seq, N)

    patches = extract_patches(pixels, patch)          # [B, N, CPP]

    # Pack the 12 (D,) bias/gain vectors and the 4 (D, D) attention weights
    # into two stacked tensors -> 8 kernel inputs instead of 20.
    vecs = jnp.stack([
        params["b_patch"],
        params["ln1_g"], params["ln1_b"],
        params["bq"], params["bk"], params["bv"], params["bo"],
        params["ln2_g"], params["ln2_b"],
        params["b2"],
        params["lnf_g"], params["lnf_b"],
    ])                                                # [12, D]
    wqkvo = jnp.stack([params["wq"], params["wk"],
                       params["wv"], params["wo"]])   # [4, D, D]
    b1 = params["b1"][None, :]                        # [1, Dm]

    features = pl.pallas_call(
        fused_vision_kernel,
        out_shape=jax.ShapeDtypeStruct((B, S, D), jnp.float32),
        grid_spec=pltpu.PrefetchScalarGridSpec(
            num_scalar_prefetch=0,
            grid=(B,),
            in_specs=[
                pl.BlockSpec((1, N, CPP), lambda b: (b, 0, 0)),   # patches
                pl.BlockSpec((CPP, D), lambda b: (0, 0)),         # w_patch
                pl.BlockSpec((N, D), lambda b: (0, 0)),           # pos
                pl.BlockSpec((12, D), lambda b: (0, 0)),          # packed biases/gains
                pl.BlockSpec((4, D, D), lambda b: (0, 0, 0)),     # wq/wk/wv/wo
                pl.BlockSpec((D, Dm), lambda b: (0, 0)),          # w1
                pl.BlockSpec((1, Dm), lambda b: (0, 0)),          # b1
                pl.BlockSpec((Dm, D), lambda b: (0, 0)),          # w2
            ],
            out_specs=pl.BlockSpec((1, S, D), lambda b: (b, 0, 0)),
        ),
        compiler_params=pltpu.CompilerParams(
            dimension_semantics=("parallel",),        # lets v7x split B over 2 TCs
        ),
    )(patches, params["w_patch"], params["pos"], vecs, wqkvo,
      params["w1"], b1, params["w2"])

    return features                                    # already [:, :max_seq, :]


# ---------------------------------------------------------------------------
# Pure-JAX reference (correctness sanity check)
# ---------------------------------------------------------------------------
def reference_forward(pixels, params, patch, max_seq):
    patches = extract_patches(pixels, patch)
    x = patches @ params["w_patch"] + params["b_patch"] + params["pos"]

    def ln(v, g, b, eps=1e-6):
        m = jnp.mean(v, axis=-1, keepdims=True)
        var = jnp.mean((v - m) ** 2, axis=-1, keepdims=True)
        return (v - m) * jax.lax.rsqrt(var + eps) * g + b

    h = ln(x, params["ln1_g"], params["ln1_b"])
    q = h @ params["wq"] + params["bq"]
    k = h @ params["wk"] + params["bk"]
    v = h @ params["wv"] + params["bv"]
    scale = 1.0 / math.sqrt(x.shape[-1])
    scores = jnp.einsum("bqd,bkd->bqk", q, k) * scale
    attn = jax.nn.softmax(scores, axis=-1)
    ctx = jnp.einsum("bqk,bkd->bqd", attn, v)
    x = x + ctx @ params["wo"] + params["bo"]
    h2 = ln(x, params["ln2_g"], params["ln2_b"])
    m1 = jax.nn.gelu(h2 @ params["w1"] + params["b1"], approximate=True)
    x = x + m1 @ params["w2"] + params["b2"]
    x = ln(x, params["lnf_g"], params["lnf_b"])
    return x[:, :max_seq, :]


# ---------------------------------------------------------------------------
# Main
# ---------------------------------------------------------------------------
if __name__ == "__main__":
    B, C, H, W = 2, 3, 16, 16
    PATCH = 4
    D = 128                      # multiple of 128 -> lane-dense (unmasked) stores
    D_MLP = 4 * D
    MAX_SEQ = 8
    N = (H // PATCH) * (W // PATCH)          # 16
    CPP = C * PATCH * PATCH                  # 48

    key = jax.random.PRNGKey(0)
    keys = jax.random.split(key, 22)
    std = 0.02

    # Non-trivial LN gains/biases so any packed-row index mix-up is caught.
    params = {
        "w_patch": std * jax.random.normal(keys[0], (CPP, D), jnp.float32),
        "b_patch": std * jax.random.normal(keys[1], (D,), jnp.float32),
        "pos":     std * jax.random.normal(keys[2], (N, D), jnp.float32),
        "ln1_g": 1.0 + 0.1 * jax.random.normal(keys[16], (D,), jnp.float32),
        "ln1_b": 0.1 * jax.random.normal(keys[17], (D,), jnp.float32),
        "wq": std * jax.random.normal(keys[3], (D, D), jnp.float32),
        "bq": std * jax.random.normal(keys[4], (D,), jnp.float32),
        "wk": std * jax.random.normal(keys[5], (D, D), jnp.float32),
        "bk": std * jax.random.normal(keys[6], (D,), jnp.float32),
        "wv": std * jax.random.normal(keys[7], (D, D), jnp.float32),
        "bv": std * jax.random.normal(keys[8], (D,), jnp.float32),
        "wo": std * jax.random.normal(keys[9], (D, D), jnp.float32),
        "bo": std * jax.random.normal(keys[10], (D,), jnp.float32),
        "ln2_g": 1.0 + 0.1 * jax.random.normal(keys[18], (D,), jnp.float32),
        "ln2_b": 0.1 * jax.random.normal(keys[19], (D,), jnp.float32),
        "w1": std * jax.random.normal(keys[11], (D, D_MLP), jnp.float32),
        "b1": std * jax.random.normal(keys[12], (D_MLP,), jnp.float32),
        "w2": std * jax.random.normal(keys[13], (D_MLP, D), jnp.float32),
        "b2": std * jax.random.normal(keys[14], (D,), jnp.float32),
        "lnf_g": 1.0 + 0.1 * jax.random.normal(keys[20], (D,), jnp.float32),
        "lnf_b": 0.1 * jax.random.normal(keys[21], (D,), jnp.float32),
    }

    pixels = jax.random.normal(keys[15], (B, C, H, W), jnp.float32)

    out = vision_pixel_embedding(pixels, params, PATCH, MAX_SEQ)
    out = jax.block_until_ready(out)

    ref = reference_forward(pixels, params, PATCH, MAX_SEQ)
    assert out.shape == (B, MAX_SEQ, D), out.shape
    # Tolerance loosened slightly vs f32-exact because the softmax denominator
    # uses the EUP approximate reciprocal; real bugs are orders of magnitude larger.
    assert jnp.allclose(out, ref, rtol=5e-3, atol=5e-3), "mismatch vs reference"

    print("KERNEL_OK")
</pallas_src>

<mosaic_0001>
module attributes {stable_mosaic.version = 11 : i64} {
  func.func @fused_vision_kernel(%arg0: i32, %arg1: memref<1x16x48xf32, #tpu.memory_space<vmem>>, %arg2: memref<48x128xf32, #tpu.memory_space<vmem>>, %arg3: memref<16x128xf32, #tpu.memory_space<vmem>>, %arg4: memref<12x128xf32, #tpu.memory_space<vmem>>, %arg5: memref<4x128x128xf32, #tpu.memory_space<vmem>>, %arg6: memref<128x512xf32, #tpu.memory_space<vmem>>, %arg7: memref<1x512xf32, #tpu.memory_space<vmem>>, %arg8: memref<512x128xf32, #tpu.memory_space<vmem>>, %arg9: memref<1x8x128xf32, #tpu.memory_space<vmem>>) attributes {dimension_semantics = [#tpu.dimension_semantics<parallel>], iteration_bounds = array<i64: 2>, scalar_prefetch = 0 : i64, scratch_operands = 0 : i64, tpu.core_type = #tpu.core_type<tc>, window_params = [{transform_indices = @transform_0, window_bounds = array<i64: 1, 16, 48>}, {pipeline_mode = #tpu.pipeline_mode<synchronous>, transform_indices = @transform_1, window_bounds = array<i64: 48, 128>}, {pipeline_mode = #tpu.pipeline_mode<synchronous>, transform_indices = @transform_2, window_bounds = array<i64: 16, 128>}, {pipeline_mode = #tpu.pipeline_mode<synchronous>, transform_indices = @transform_3, window_bounds = array<i64: 12, 128>}, {pipeline_mode = #tpu.pipeline_mode<synchronous>, transform_indices = @transform_4, window_bounds = array<i64: 4, 128, 128>}, {pipeline_mode = #tpu.pipeline_mode<synchronous>, transform_indices = @transform_5, window_bounds = array<i64: 128, 512>}, {pipeline_mode = #tpu.pipeline_mode<synchronous>, transform_indices = @transform_6, window_bounds = array<i64: 1, 512>}, {pipeline_mode = #tpu.pipeline_mode<synchronous>, transform_indices = @transform_7, window_bounds = array<i64: 512, 128>}, {transform_indices = @transform_8, window_bounds = array<i64: 1, 8, 128>}]} {
    %c0 = arith.constant 0 : index
    %c0_0 = arith.constant 0 : index
    %0 = vector.load %arg4[%c0, %c0_0] : memref<12x128xf32, #tpu.memory_space<vmem>>, vector<12x128xf32>
    %c0_1 = arith.constant 0 : index
    %c0_2 = arith.constant 0 : index
    %c0_3 = arith.constant 0 : index
    %1 = vector.load %arg1[%c0_1, %c0_2, %c0_3] : memref<1x16x48xf32, #tpu.memory_space<vmem>>, vector<1x16x48xf32>
    %2 = vector.shape_cast %1 : vector<1x16x48xf32> to vector<16x48xf32>
    %c0_4 = arith.constant 0 : index
    %c0_5 = arith.constant 0 : index
    %3 = vector.load %arg2[%c0_4, %c0_5] : memref<48x128xf32, #tpu.memory_space<vmem>>, vector<48x128xf32>
    %cst = arith.constant dense<0.000000e+00> : vector<16x128xf32>
    %4 = tpu.matmul %2, %3, %cst {dimension_numbers = #tpu.dot_dimension_numbers<[1], [0], [0], [1], [0, 0, 1, 1], [], []>} : vector<16x48xf32>, vector<48x128xf32>, vector<16x128xf32> -> vector<16x128xf32>
    %5 = vector.extract_strided_slice %0 {offsets = [0, 0], sizes = [1, 128], strides = [1, 1]} : vector<12x128xf32> to vector<1x128xf32>
    %6 = vector.broadcast %5 : vector<1x128xf32> to vector<16x128xf32>
    %7 = arith.addf %4, %6 : vector<16x128xf32>
    %c0_6 = arith.constant 0 : index
    %c0_7 = arith.constant 0 : index
    %8 = vector.load %arg3[%c0_6, %c0_7] : memref<16x128xf32, #tpu.memory_space<vmem>>, vector<16x128xf32>
    %9 = arith.addf %7, %8 : vector<16x128xf32>
    %cst_8 = arith.constant dense<0.000000e+00> : vector<16xf32>
    %10 = vector.multi_reduction <add>, %9, %cst_8 [1] : vector<16x128xf32> to vector<16xf32>
    %11 = vector.shape_cast %10 : vector<16xf32> to vector<16x1xf32>
    %cst_9 = arith.constant 1.280000e+02 : f32
    %12 = vector.broadcast %cst_9 : f32 to vector<16x1xf32>
    %13 = arith.divf %11, %12 : vector<16x1xf32>
    %14 = vector.broadcast %13 : vector<16x1xf32> to vector<16x128xf32>
    %15 = arith.subf %9, %14 : vector<16x128xf32>
    %16 = arith.mulf %15, %15 : vector<16x128xf32>
    %cst_10 = arith.constant dense<0.000000e+00> : vector<16xf32>
    %17 = vector.multi_reduction <add>, %16, %cst_10 [1] : vector<16x128xf32> to vector<16xf32>
    %18 = vector.shape_cast %17 : vector<16xf32> to vector<16x1xf32>
    %cst_11 = arith.constant 1.280000e+02 : f32
    %19 = vector.broadcast %cst_11 : f32 to vector<16x1xf32>
    %20 = arith.divf %18, %19 : vector<16x1xf32>
    %21 = vector.broadcast %13 : vector<16x1xf32> to vector<16x128xf32>
    %22 = arith.subf %9, %21 : vector<16x128xf32>
    %cst_12 = arith.constant 9.99999997E-7 : f32
    %23 = vector.broadcast %cst_12 : f32 to vector<16x1xf32>
    %24 = arith.addf %20, %23 : vector<16x1xf32>
    %25 = math.rsqrt %24 : vector<16x1xf32>
    %26 = vector.broadcast %25 : vector<16x1xf32> to vector<16x128xf32>
    %27 = arith.mulf %22, %26 : vector<16x128xf32>
    %28 = vector.extract_strided_slice %0 {offsets = [1, 0], sizes = [1, 128], strides = [1, 1]} : vector<12x128xf32> to vector<1x128xf32>
    %29 = vector.broadcast %28 : vector<1x128xf32> to vector<16x128xf32>
    %30 = arith.mulf %27, %29 : vector<16x128xf32>
    %31 = vector.extract_strided_slice %0 {offsets = [2, 0], sizes = [1, 128], strides = [1, 1]} : vector<12x128xf32> to vector<1x128xf32>
    %32 = vector.broadcast %31 : vector<1x128xf32> to vector<16x128xf32>
    %33 = arith.addf %30, %32 : vector<16x128xf32>
    %c0_13 = arith.constant 0 : index
    %c0_14 = arith.constant 0 : index
    %c0_15 = arith.constant 0 : index
    %34 = vector.load %arg5[%c0_13, %c0_14, %c0_15] : memref<4x128x128xf32, #tpu.memory_space<vmem>>, vector<1x128x128xf32>
    %35 = vector.shape_cast %34 : vector<1x128x128xf32> to vector<128x128xf32>
    %cst_16 = arith.constant dense<0.000000e+00> : vector<16x128xf32>
    %36 = tpu.matmul %33, %35, %cst_16 {dimension_numbers = #tpu.dot_dimension_numbers<[1], [0], [0], [1], [0, 0, 1, 1], [], []>} : vector<16x128xf32>, vector<128x128xf32>, vector<16x128xf32> -> vector<16x128xf32>
    %37 = vector.extract_strided_slice %0 {offsets = [3, 0], sizes = [1, 128], strides = [1, 1]} : vector<12x128xf32> to vector<1x128xf32>
    %38 = vector.broadcast %37 : vector<1x128xf32> to vector<16x128xf32>
    %39 = arith.addf %36, %38 : vector<16x128xf32>
    %c1 = arith.constant 1 : index
    %c0_17 = arith.constant 0 : index
    %c0_18 = arith.constant 0 : index
    %40 = vector.load %arg5[%c1, %c0_17, %c0_18] : memref<4x128x128xf32, #tpu.memory_space<vmem>>, vector<1x128x128xf32>
    %41 = vector.shape_cast %40 : vector<1x128x128xf32> to vector<128x128xf32>
    %cst_19 = arith.constant dense<0.000000e+00> : vector<16x128xf32>
    %42 = tpu.matmul %33, %41, %cst_19 {dimension_numbers = #tpu.dot_dimension_numbers<[1], [0], [0], [1], [0, 0, 1, 1], [], []>} : vector<16x128xf32>, vector<128x128xf32>, vector<16x128xf32> -> vector<16x128xf32>
    %43 = vector.extract_strided_slice %0 {offsets = [4, 0], sizes = [1, 128], strides = [1, 1]} : vector<12x128xf32> to vector<1x128xf32>
    %44 = vector.broadcast %43 : vector<1x128xf32> to vector<16x128xf32>
    %45 = arith.addf %42, %44 : vector<16x128xf32>
    %c2 = arith.constant 2 : index
    %c0_20 = arith.constant 0 : index
    %c0_21 = arith.constant 0 : index
    %46 = vector.load %arg5[%c2, %c0_20, %c0_21] : memref<4x128x128xf32, #tpu.memory_space<vmem>>, vector<1x128x128xf32>
    %47 = vector.shape_cast %46 : vector<1x128x128xf32> to vector<128x128xf32>
    %cst_22 = arith.constant dense<0.000000e+00> : vector<16x128xf32>
    %48 = tpu.matmul %33, %47, %cst_22 {dimension_numbers = #tpu.dot_dimension_numbers<[1], [0], [0], [1], [0, 0, 1, 1], [], []>} : vector<16x128xf32>, vector<128x128xf32>, vector<16x128xf32> -> vector<16x128xf32>
    %49 = vector.extract_strided_slice %0 {offsets = [5, 0], sizes = [1, 128], strides = [1, 1]} : vector<12x128xf32> to vector<1x128xf32>
    %50 = vector.broadcast %49 : vector<1x128xf32> to vector<16x128xf32>
    %51 = arith.addf %48, %50 : vector<16x128xf32>
    %cst_23 = arith.constant dense<0.000000e+00> : vector<16x16xf32>
    %52 = tpu.matmul %39, %45, %cst_23 {dimension_numbers = #tpu.dot_dimension_numbers<[1], [1], [0], [0], [0, 0, 1, 0], [], []>} : vector<16x128xf32>, vector<16x128xf32>, vector<16x16xf32> -> vector<16x16xf32>
    %cst_24 = arith.constant 0.0883883461 : f32
    %53 = vector.broadcast %cst_24 : f32 to vector<16x16xf32>
    %54 = arith.mulf %52, %53 : vector<16x16xf32>
    %cst_25 = arith.constant dense<0xFF800000> : vector<16xf32>
    %55 = vector.multi_reduction <maximumf>, %54, %cst_25 [1] : vector<16x16xf32> to vector<16xf32>
    %56 = vector.shape_cast %55 : vector<16xf32> to vector<16x1xf32>
    %57 = vector.broadcast %56 : vector<16x1xf32> to vector<16x16xf32>
    %58 = arith.subf %54, %57 : vector<16x16xf32>
    %59 = math.exp %58 : vector<16x16xf32>
    %cst_26 = arith.constant dense<0.000000e+00> : vector<16xf32>
    %60 = vector.multi_reduction <add>, %59, %cst_26 [1] : vector<16x16xf32> to vector<16xf32>
    %61 = vector.shape_cast %60 : vector<16xf32> to vector<16x1xf32>
    %62 = tpu.reciprocal %61 {approx = true} : vector<16x1xf32> -> vector<16x1xf32>
    %63 = vector.broadcast %62 : vector<16x1xf32> to vector<16x16xf32>
    %64 = arith.mulf %59, %63 : vector<16x16xf32>
    %cst_27 = arith.constant dense<0.000000e+00> : vector<16x128xf32>
    %65 = tpu.matmul %64, %51, %cst_27 {dimension_numbers = #tpu.dot_dimension_numbers<[1], [0], [0], [1], [0, 0, 1, 1], [], []>} : vector<16x16xf32>, vector<16x128xf32>, vector<16x128xf32> -> vector<16x128xf32>
    %c3 = arith.constant 3 : index
    %c0_28 = arith.constant 0 : index
    %c0_29 = arith.constant 0 : index
    %66 = vector.load %arg5[%c3, %c0_28, %c0_29] : memref<4x128x128xf32, #tpu.memory_space<vmem>>, vector<1x128x128xf32>
    %67 = vector.shape_cast %66 : vector<1x128x128xf32> to vector<128x128xf32>
    %cst_30 = arith.constant dense<0.000000e+00> : vector<16x128xf32>
    %68 = tpu.matmul %65, %67, %cst_30 {dimension_numbers = #tpu.dot_dimension_numbers<[1], [0], [0], [1], [0, 0, 1, 1], [], []>} : vector<16x128xf32>, vector<128x128xf32>, vector<16x128xf32> -> vector<16x128xf32>
    %69 = arith.addf %9, %68 : vector<16x128xf32>
    %70 = vector.extract_strided_slice %0 {offsets = [6, 0], sizes = [1, 128], strides = [1, 1]} : vector<12x128xf32> to vector<1x128xf32>
    %71 = vector.broadcast %70 : vector<1x128xf32> to vector<16x128xf32>
    %72 = arith.addf %69, %71 : vector<16x128xf32>
    %cst_31 = arith.constant dense<0.000000e+00> : vector<16xf32>
    %73 = vector.multi_reduction <add>, %72, %cst_31 [1] : vector<16x128xf32> to vector<16xf32>
    %74 = vector.shape_cast %73 : vector<16xf32> to vector<16x1xf32>
    %cst_32 = arith.constant 1.280000e+02 : f32
    %75 = vector.broadcast %cst_32 : f32 to vector<16x1xf32>
    %76 = arith.divf %74, %75 : vector<16x1xf32>
    %77 = vector.broadcast %76 : vector<16x1xf32> to vector<16x128xf32>
    %78 = arith.subf %72, %77 : vector<16x128xf32>
    %79 = arith.mulf %78, %78 : vector<16x128xf32>
    %cst_33 = arith.constant dense<0.000000e+00> : vector<16xf32>
    %80 = vector.multi_reduction <add>, %79, %cst_33 [1] : vector<16x128xf32> to vector<16xf32>
    %81 = vector.shape_cast %80 : vector<16xf32> to vector<16x1xf32>
    %cst_34 = arith.constant 1.280000e+02 : f32
    %82 = vector.broadcast %cst_34 : f32 to vector<16x1xf32>
    %83 = arith.divf %81, %82 : vector<16x1xf32>
    %84 = vector.broadcast %76 : vector<16x1xf32> to vector<16x128xf32>
    %85 = arith.subf %72, %84 : vector<16x128xf32>
    %cst_35 = arith.constant 9.99999997E-7 : f32
    %86 = vector.broadcast %cst_35 : f32 to vector<16x1xf32>
    %87 = arith.addf %83, %86 : vector<16x1xf32>
    %88 = math.rsqrt %87 : vector<16x1xf32>
    %89 = vector.broadcast %88 : vector<16x1xf32> to vector<16x128xf32>
    %90 = arith.mulf %85, %89 : vector<16x128xf32>
    %91 = vector.extract_strided_slice %0 {offsets = [7, 0], sizes = [1, 128], strides = [1, 1]} : vector<12x128xf32> to vector<1x128xf32>
    %92 = vector.broadcast %91 : vector<1x128xf32> to vector<16x128xf32>
    %93 = arith.mulf %90, %92 : vector<16x128xf32>
    %94 = vector.extract_strided_slice %0 {offsets = [8, 0], sizes = [1, 128], strides = [1, 1]} : vector<12x128xf32> to vector<1x128xf32>
    %95 = vector.broadcast %94 : vector<1x128xf32> to vector<16x128xf32>
    %96 = arith.addf %93, %95 : vector<16x128xf32>
    %c0_36 = arith.constant 0 : index
    %c0_37 = arith.constant 0 : index
    %97 = vector.load %arg6[%c0_36, %c0_37] : memref<128x512xf32, #tpu.memory_space<vmem>>, vector<128x512xf32>
    %cst_38 = arith.constant dense<0.000000e+00> : vector<16x512xf32>
    %98 = tpu.matmul %96, %97, %cst_38 {dimension_numbers = #tpu.dot_dimension_numbers<[1], [0], [0], [1], [0, 0, 1, 1], [], []>} : vector<16x128xf32>, vector<128x512xf32>, vector<16x512xf32> -> vector<16x512xf32>
    %c0_39 = arith.constant 0 : index
    %c0_40 = arith.constant 0 : index
    %99 = vector.load %arg7[%c0_39, %c0_40] : memref<1x512xf32, #tpu.memory_space<vmem>>, vector<1x512xf32>
    %100 = vector.broadcast %99 : vector<1x512xf32> to vector<16x512xf32>
    %101 = arith.addf %98, %100 : vector<16x512xf32>
    %102 = arith.mulf %101, %101 : vector<16x512xf32>
    %103 = arith.mulf %101, %102 : vector<16x512xf32>
    %cst_41 = arith.constant 4.471500e-02 : f32
    %104 = vector.broadcast %cst_41 : f32 to vector<16x512xf32>
    %105 = arith.mulf %104, %103 : vector<16x512xf32>
    %106 = arith.addf %101, %105 : vector<16x512xf32>
    %cst_42 = arith.constant 0.797884583 : f32
    %107 = vector.broadcast %cst_42 : f32 to vector<16x512xf32>
    %108 = arith.mulf %107, %106 : vector<16x512xf32>
    %109 = math.tanh %108 : vector<16x512xf32>
    %cst_43 = arith.constant 1.000000e+00 : f32
    %110 = vector.broadcast %cst_43 : f32 to vector<16x512xf32>
    %111 = arith.addf %110, %109 : vector<16x512xf32>
    %cst_44 = arith.constant 5.000000e-01 : f32
    %112 = vector.broadcast %cst_44 : f32 to vector<16x512xf32>
    %113 = arith.mulf %112, %111 : vector<16x512xf32>
    %114 = arith.mulf %101, %113 : vector<16x512xf32>
    %c0_45 = arith.constant 0 : index
    %c0_46 = arith.constant 0 : index
    %115 = vector.load %arg8[%c0_45, %c0_46] : memref<512x128xf32, #tpu.memory_space<vmem>>, vector<512x128xf32>
    %cst_47 = arith.constant dense<0.000000e+00> : vector<16x128xf32>
    %116 = tpu.matmul %114, %115, %cst_47 {dimension_numbers = #tpu.dot_dimension_numbers<[1], [0], [0], [1], [0, 0, 1, 1], [], []>} : vector<16x512xf32>, vector<512x128xf32>, vector<16x128xf32> -> vector<16x128xf32>
    %117 = arith.addf %72, %116 : vector<16x128xf32>
    %118 = vector.extract_strided_slice %0 {offsets = [9, 0], sizes = [1, 128], strides = [1, 1]} : vector<12x128xf32> to vector<1x128xf32>
    %119 = vector.broadcast %118 : vector<1x128xf32> to vector<16x128xf32>
    %120 = arith.addf %117, %119 : vector<16x128xf32>
    %121 = vector.extract_strided_slice %120 {offsets = [0, 0], sizes = [8, 128], strides = [1, 1]} : vector<16x128xf32> to vector<8x128xf32>
    %cst_48 = arith.constant dense<0.000000e+00> : vector<8xf32>
    %122 = vector.multi_reduction <add>, %121, %cst_48 [1] : vector<8x128xf32> to vector<8xf32>
    %123 = vector.shape_cast %122 : vector<8xf32> to vector<8x1xf32>
    %cst_49 = arith.constant 1.280000e+02 : f32
    %124 = vector.broadcast %cst_49 : f32 to vector<8x1xf32>
    %125 = arith.divf %123, %124 : vector<8x1xf32>
    %126 = vector.broadcast %125 : vector<8x1xf32> to vector<8x128xf32>
    %127 = arith.subf %121, %126 : vector<8x128xf32>
    %128 = arith.mulf %127, %127 : vector<8x128xf32>
    %cst_50 = arith.constant dense<0.000000e+00> : vector<8xf32>
    %129 = vector.multi_reduction <add>, %128, %cst_50 [1] : vector<8x128xf32> to vector<8xf32>
    %130 = vector.shape_cast %129 : vector<8xf32> to vector<8x1xf32>
    %cst_51 = arith.constant 1.280000e+02 : f32
    %131 = vector.broadcast %cst_51 : f32 to vector<8x1xf32>
    %132 = arith.divf %130, %131 : vector<8x1xf32>
    %133 = vector.broadcast %125 : vector<8x1xf32> to vector<8x128xf32>
    %134 = arith.subf %121, %133 : vector<8x128xf32>
    %cst_52 = arith.constant 9.99999997E-7 : f32
    %135 = vector.broadcast %cst_52 : f32 to vector<8x1xf32>
    %136 = arith.addf %132, %135 : vector<8x1xf32>
    %137 = math.rsqrt %136 : vector<8x1xf32>
    %138 = vector.broadcast %137 : vector<8x1xf32> to vector<8x128xf32>
    %139 = arith.mulf %134, %138 : vector<8x128xf32>
    %140 = vector.extract_strided_slice %0 {offsets = [10, 0], sizes = [1, 128], strides = [1, 1]} : vector<12x128xf32> to vector<1x128xf32>
    %141 = vector.broadcast %140 : vector<1x128xf32> to vector<8x128xf32>
    %142 = arith.mulf %139, %141 : vector<8x128xf32>
    %143 = vector.extract_strided_slice %0 {offsets = [11, 0], sizes = [1, 128], strides = [1, 1]} : vector<12x128xf32> to vector<1x128xf32>
    %144 = vector.broadcast %143 : vector<1x128xf32> to vector<8x128xf32>
    %145 = arith.addf %142, %144 : vector<8x128xf32>
    %c0_53 = arith.constant 0 : index
    %c0_54 = arith.constant 0 : index
    %c0_55 = arith.constant 0 : index
    %146 = vector.load %arg9[%c0_53, %c0_54, %c0_55] : memref<1x8x128xf32, #tpu.memory_space<vmem>>, vector<1x8x128xf32>
    %147 = vector.shape_cast %146 : vector<1x8x128xf32> to vector<8x128xf32>
    %148 = vector.shape_cast %145 : vector<8x128xf32> to vector<1x8x128xf32>
    tpu.vector_store %arg9[%c0_53, %c0_54, %c0_55], %148 {strides = array<i32>} : memref<1x8x128xf32, #tpu.memory_space<vmem>>, vector<1x8x128xf32>,
    return
  }
  func.func @transform_0(%arg0: i32) -> (i32, i32, i32) {
    %c0_i32 = arith.constant 0 : i32
    %c0_i32_0 = arith.constant 0 : i32
    %c0_i32_1 = arith.constant 0 : i32
    return %arg0, %c0_i32, %c0_i32_0 : i32, i32, i32
  }
  func.func @transform_1(%arg0: i32) -> (i32, i32) {
    %c0_i32 = arith.constant 0 : i32
    %c0_i32_0 = arith.constant 0 : i32
    %c0_i32_1 = arith.constant 0 : i32
    return %c0_i32, %c0_i32_0 : i32, i32
  }
  func.func @transform_2(%arg0: i32) -> (i32, i32) {
    %c0_i32 = arith.constant 0 : i32
    %c0_i32_0 = arith.constant 0 : i32
    %c0_i32_1 = arith.constant 0 : i32
    return %c0_i32, %c0_i32_0 : i32, i32
  }
  func.func @transform_3(%arg0: i32) -> (i32, i32) {
    %c0_i32 = arith.constant 0 : i32
    %c0_i32_0 = arith.constant 0 : i32
    %c0_i32_1 = arith.constant 0 : i32
    return %c0_i32, %c0_i32_0 : i32, i32
  }
  func.func @transform_4(%arg0: i32) -> (i32, i32, i32) {
    %c0_i32 = arith.constant 0 : i32
    %c0_i32_0 = arith.constant 0 : i32
    %c0_i32_1 = arith.constant 0 : i32
    %c0_i32_2 = arith.constant 0 : i32
    return %c0_i32, %c0_i32_0, %c0_i32_1 : i32, i32, i32
  }
  func.func @transform_5(%arg0: i32) -> (i32, i32) {
    %c0_i32 = arith.constant 0 : i32
    %c0_i32_0 = arith.constant 0 : i32
    %c0_i32_1 = arith.constant 0 : i32
    return %c0_i32, %c0_i32_0 : i32, i32
  }
  func.func @transform_6(%arg0: i32) -> (i32, i32) {
    %c0_i32 = arith.constant 0 : i32
    %c0_i32_0 = arith.constant 0 : i32
    %c0_i32_1 = arith.constant 0 : i32
    return %c0_i32, %c0_i32_0 : i32, i32
  }
  func.func @transform_7(%arg0: i32) -> (i32, i32) {
    %c0_i32 = arith.constant 0 : i32
    %c0_i32_0 = arith.constant 0 : i32
    %c0_i32_1 = arith.constant 0 : i32
    return %c0_i32, %c0_i32_0 : i32, i32
  }
  func.func @transform_8(%arg0: i32) -> (i32, i32, i32) {
    %c0_i32 = arith.constant 0 : i32
    %c0_i32_0 = arith.constant 0 : i32
    %c0_i32_1 = arith.constant 0 : i32
    return %arg0, %c0_i32, %c0_i32_0 : i32, i32, i32
  }
}

</mosaic_0001>

<bundles_post_ra>
// kernel: tpu_custom_call.1
= control target key start
LH: loop header
LB: loop body
LE: loop exit
PB: predicated region body
PF: predicated region fallthrough
CT: control target
= control target key end

     0   :  { %s3452_s0 = inlined_call_operand.hbm [shape: f32[2,16,48], index: 0, kind: input, shape index: {}]   ;;  %s3453_s1 = inlined_call_operand.hbm [shape: f32[48,128], index: 1, kind: input, shape index: {}]   ;;  %s3454_s2 = inlined_call_operand.hbm [shape: f32[16,128], index: 2, kind: input, shape index: {}]   ;;  %s3455_s3 = inlined_call_operand.hbm [shape: f32[12,128], index: 3, kind: input, shape index: {}]   ;;  %s3456_s4 = inlined_call_operand.hbm [shape: f32[4,128,128], index: 4, kind: input, shape index: {}]   ;;  %s3457_s5 = inlined_call_operand.hbm [shape: f32[128,512], index: 5, kind: input, shape index: {}]   ;;  %s3458_s6 = inlined_call_operand.vmem [shape: f32[1,512], index: 6, kind: input, shape index: {}]   ;;  %s3459_s7 = inlined_call_operand.hbm [shape: f32[512,128], index: 7, kind: input, shape index: {}]   ;;  %s3460_s8 = inlined_call_operand.hbm [shape: f32[2,8,128], index: 8, kind: output, shape index: {}]  }
   0x1   :  { %3468 = sst [smem:[#allocation20_spill]] %s3453_s1 }
   0x2   :  { %3469 = sst [smem:[#allocation21_spill]] %s3455_s3 }
   0x3   :  { %13 = vsyncpa [#allocation3], 0 }
   0x4   :  { %15 = vsyncpa [#allocation3 + $0x1], 0 }
   0x5   :  { %16 = vsyncpa [#allocation6], 0 }
   0x6   :  { %17 = vsyncpa [#allocation9], 0 }
   0x7   :  { %18 = vsyncpa [#allocation12], 0 }
   0x8   :  { %19 = vsyncpa [#allocation4], 0 }
   0x9   :  { %21 = vsyncpa [#allocation4 + $0x1], 0  ;;  %s2962_s27 = smov 0   ;;  %s2964_s28 = smov 0  }
   0xa   :  { %s2966_s29 = smov 0   ;;  %s2968_s30 = smov 0  }
   0xb LB: > { %s2904_s9 = smov [#allocation5]   ;;  %s2983_s11 = sadd.s32 4294967295, %s2902_s30   ;;  %s2902_s30 = sphi %s2968_s30, %s3496_s30   ;;  %s2898_s29 = sphi %s2966_s29, %s3495_s29   ;;  %s2894_s28 = sphi %s2964_s28, %s3494_s28   ;;  %s2890_s27 = sphi %s2962_s27, %s3493_s27  }
   0xc   : > { %s243_s10 = sshll.u32 %s2904_s9, 4  ;;  %p1842_p0 = scmp.ge.s32.totalorder %s2902_s30, 1  ;;  %s2988_s10 = int_to_ptr.vmem [resolvable:$true] %s243_s10 }
   0xd   : > { %p3465_p1 = scmp.eq.s32.totalorder %s2983_s11, 0  ;;  %p231_p2 = scmp.lt.s32.totalorder %s2902_s30, 3 }
   0xe   : > { %s2905_s13 = smov [#allocation8]   ;;  %s2906_s16 = smov [#allocation11]  }
   0xf   : > { %p2990_p3 = pnand %p1842_p0, %p231_p2  ;;  %s269_s14 = sshll.u32 %s2905_s13, 4  ;;  %s3003_s14 = int_to_ptr.vmem [resolvable:$true] %s269_s14 }
  0x10   : > { %s295_s17 = sshll.u32 %s2906_s16, 4  ;;  %s3472_s1 = sld [smem:[#allocation20_spill]]  ;;  %s3005_s17 = int_to_ptr.vmem [resolvable:$true] %s295_s17 }
  0x11   : > { %s3470_s12 = scalar_select %p2990_p3, 1, 0 }
  0x12   : > { %p2508_p5 = pneg %p2990_p3 }
  0x14   : > { %p2999_p6 = pnand %p2508_p5, %p3465_p1 }
  0x16   : > { %s2626_s20 = scalar_lea.hbm %s3472_s1, 768  ;;  %p3015_p8 = pneg %p2999_p6 }
  0x17   : > { %p2627_p7 = scmp.ne.s32.totalorder %s3472_s1, %s2626_s20  ;;  %p2633_p11 = scmp.lt.u32.totalorder %s2626_s20, %s3472_s1 }
  0x19   : > { %p2629_p9 = pnand %p3015_p8, %p2627_p7 }
  0x1b   : > { %p2630_p10 = pneg %p2629_p9 }
  0x1d   : > { %p2635_p12 = pnand %p2633_p11, %p2630_p10 }
  0x1f   : > { %2638 = shalt.err (!%p2635_p12)
}
  0x20   : > { %s2639_s26 = scalar_lea.vmem %s2988_s10, 768  ;;  %p2647_p5 = scmp.lt.s32.totalorder %s2988_s10, %s2988_s10 }
  0x21   : > { %p2640_p13 = scmp.ne.s32.totalorder %s2988_s10, %s2639_s26  ;;  %p2648_p4 = scmp.lt.s32.totalorder %s2639_s26, %s2639_s26 }
  0x23   : > { %p2642_p0 = pnand %p2640_p13, %p3015_p8  ;;  %p2649_p7 = por %p2648_p4, %p2647_p5 }
  0x25   : > { %p2643_p2 = pneg %p2642_p0 }
  0x27   : > { %p2650_p9 = pnand %p2649_p7, %p2643_p2 }
  0x29   : > { %2653 = shalt.err (!%p2650_p9)
}
  0x2a   : > { %s3461_s9 = smov 128   ;;  %s3463_s13 = smov 8  }
  0x2b   : > { %2511 = dma.hbm_to_vmem [thread:$0]  (!%p2999_p6), %s3472_s1, 768, %s2988_s10, [#allocation6], %s3461_s9, %s3461_s9, %s3463_s13  }
  0x2c   : > { %s3474_s3 = sld [smem:[#allocation21_spill]] }
  0x32   : > { %s2654_s21 = scalar_lea.hbm %s3474_s3, 256 }
  0x33   : > { %p2655_p4 = scmp.ne.s32.totalorder %s3474_s3, %s2654_s21  ;;  %p2661_p12 = scmp.lt.u32.totalorder %s2654_s21, %s3474_s3 }
  0x35   : > { %p2657_p10 = pnand %p2655_p4, %p3015_p8 }
  0x37   : > { %p2658_p11 = pneg %p2657_p10 }
  0x39   : > { %p2663_p13 = pnand %p2661_p12, %p2658_p11 }
  0x3b   : > { %2666 = shalt.err (!%p2663_p13)
}
  0x3c   : > { %s2667_s10 = scalar_lea.vmem %s3003_s14, 256  ;;  %p2675_p7 = scmp.lt.s32.totalorder %s3003_s14, %s3003_s14 }
  0x3d   : > { %p2668_p0 = scmp.ne.s32.totalorder %s3003_s14, %s2667_s10  ;;  %p2676_p9 = scmp.lt.s32.totalorder %s2667_s10, %s2667_s10 }
  0x3f   : > { %p2670_p2 = pnand %p2668_p0, %p3015_p8  ;;  %p2677_p4 = por %p2676_p9, %p2675_p7 }
  0x41   : > { %p2671_p5 = pneg %p2670_p2 }
  0x43   : > { %p2678_p10 = pnand %p2677_p4, %p2671_p5 }
  0x45   : > { %2681 = shalt.err (!%p2678_p10)
}
  0x46   : > { %2517 = dma.hbm_to_vmem [thread:$0]  (!%p2999_p6), %s3474_s3, 256, %s3003_s14, [#allocation9], %s3461_s9, %s3461_s9, %s3463_s13  }
  0x47   : > { %s2682_s21 = scalar_lea.hbm %s3457_s5, 8192 }
  0x48   : > { %p2683_p11 = scmp.ne.s32.totalorder %s3457_s5, %s2682_s21  ;;  %p2689_p0 = scmp.lt.u32.totalorder %s2682_s21, %s3457_s5 }
  0x4a   : > { %p2685_p12 = pnand %p2683_p11, %p3015_p8 }
  0x4c   : > { %p2686_p13 = pneg %p2685_p12 }
  0x4e   : > { %p2691_p2 = pnand %p2689_p0, %p2686_p13 }
  0x50   : > { %2694 = shalt.err (!%p2691_p2)
}
  0x51   : > { %s2695_s14 = scalar_lea.vmem %s3005_s17, 8192  ;;  %p2703_p4 = scmp.lt.s32.totalorder %s3005_s17, %s3005_s17 }
  0x52   : > { %p2696_p5 = scmp.ne.s32.totalorder %s3005_s17, %s2695_s14  ;;  %p2704_p10 = scmp.lt.s32.totalorder %s2695_s14, %s2695_s14 }
  0x54   : > { %p2698_p7 = pnand %p2696_p5, %p3015_p8  ;;  %p2705_p11 = por %p2704_p10, %p2703_p4 }
  0x56   : > { %p2699_p9 = pneg %p2698_p7 }
  0x58   : > { %p2706_p12 = pnand %p2705_p11, %p2699_p9 }
  0x5a   : > { %2709 = shalt.err (!%p2706_p12)
}
  0x5b   : > { %s2909_s10 = smov 512   ;;  %s2910_s16 = smov 32  }
  0x5c   : > { %2523 = dma.hbm_to_vmem [thread:$0]  (!%p2999_p6), %s3457_s5, 8192, %s3005_s17, [#allocation12], %s2909_s10, %s2909_s10, %s2910_s16  }
  0x5d   : > { %s2911_s20 = smov [#allocation7]   ;;  %s2912_s22 = smov [#allocation10]  }
  0x5e   : > { %s256_s21 = sshll.u32 %s2911_s20, 4  ;;  %s282_s24 = sshll.u32 %s2912_s22, 4  ;;  %s257_s21 = int_to_ptr.vmem [resolvable:$true] %s256_s21  ;;  %s283_s24 = int_to_ptr.vmem [resolvable:$true] %s282_s24 }
  0x5f   : > { %s2710_s14 = scalar_lea.hbm %s3454_s2, 256 }
  0x60   : > { %p2711_p13 = scmp.ne.s32.totalorder %s3454_s2, %s2710_s14  ;;  %p2717_p5 = scmp.lt.u32.totalorder %s2710_s14, %s3454_s2 }
  0x62   : > { %p2713_p0 = pnand %p2711_p13, %p3015_p8 }
  0x64   : > { %p2714_p2 = pneg %p2713_p0 }
  0x66   : > { %p2719_p7 = pnand %p2717_p5, %p2714_p2 }
  0x68   : > { %2722 = shalt.err (!%p2719_p7)
}
  0x69   : > { %s2723_s17 = scalar_lea.vmem %s257_s21, 256  ;;  %p2731_p11 = scmp.lt.s32.totalorder %s257_s21, %s257_s21 }
  0x6a   : > { %p2724_p9 = scmp.ne.s32.totalorder %s257_s21, %s2723_s17  ;;  %p2732_p12 = scmp.lt.s32.totalorder %s2723_s17, %s2723_s17 }
  0x6c   : > { %p2726_p4 = pnand %p2724_p9, %p3015_p8  ;;  %p2733_p1 = por %p2732_p12, %p2731_p11 }
  0x6e   : > { %p2727_p10 = pneg %p2726_p4 }
  0x70   : > { %p2734_p3 = pnand %p2733_p1, %p2727_p10 }
  0x72   : > { %2737 = shalt.err (!%p2734_p3)
}
  0x73   : > { %s3475_s9 = smov 8   ;;  %s3476_s13 = smov 128  }
  0x74   : > { %2514 = dma.hbm_to_vmem [thread:$0]  (!%p2999_p6), %s3454_s2, 256, %s257_s21, [#allocation6], %s3476_s13, %s3476_s13, %s3475_s9  }
  0x75   : > { %s2738_s18 = scalar_lea.hbm %s3456_s4, 8192 }
  0x76   : > { %p2739_p1 = scmp.ne.s32.totalorder %s3456_s4, %s2738_s18  ;;  %p2745_p0 = scmp.lt.u32.totalorder %s2738_s18, %s3456_s4 }
  0x78   : > { %p2741_p3 = pnand %p2739_p1, %p3015_p8 }
  0x7a   : > { %p2742_p13 = pneg %p2741_p3 }
  0x7c   : > { %p2747_p2 = pnand %p2745_p0, %p2742_p13 }
  0x7e   : > { %2750 = shalt.err (!%p2747_p2)
}
  0x7f   : > { %s2751_s26 = scalar_lea.vmem %s283_s24, 8192  ;;  %p2759_p4 = scmp.lt.s32.totalorder %s283_s24, %s283_s24 }
  0x80   : > { %p2752_p5 = scmp.ne.s32.totalorder %s283_s24, %s2751_s26  ;;  %p2760_p10 = scmp.lt.s32.totalorder %s2751_s26, %s2751_s26 }
  0x82   : > { %p2754_p7 = pnand %p2752_p5, %p3015_p8  ;;  %p2761_p11 = por %p2760_p10, %p2759_p4 }
  0x84   : > { %p2755_p9 = pneg %p2754_p7 }
  0x86   : > { %p2762_p12 = pnand %p2761_p11, %p2755_p9 }
  0x88   : > { %2765 = shalt.err (!%p2762_p12)
}
  0x89   : > { %2520 = dma.hbm_to_vmem [thread:$0]  (!%p2999_p6), %s3456_s4, 8192, %s283_s24, [#allocation9], %s3476_s13, %s3476_s13, %s3475_s9  }
  0x8a   : > { %s2913_s17 = smov [#allocation13]   ;;  %s2766_s16 = scalar_lea.hbm %s3459_s7, 8192 }
  0x8b   : > { %s311_s1 = sshll.u32 %s2913_s17, 4  ;;  %p2767_p1 = scmp.ne.s32.totalorder %s3459_s7, %s2766_s16  ;;  %s312_s1 = int_to_ptr.vmem [resolvable:$true] %s311_s1 }
  0x8c   : > { %p2773_p0 = scmp.lt.u32.totalorder %s2766_s16, %s3459_s7 }
  0x8d   : > { %p2769_p3 = pnand %p2767_p1, %p3015_p8 }
  0x8f   : > { %p2770_p13 = pneg %p2769_p3 }
  0x91   : > { %p2775_p2 = pnand %p2773_p0, %p2770_p13 }
  0x93   : > { %2778 = shalt.err (!%p2775_p2)
}
  0x94   : > { %s2779_s24 = scalar_lea.vmem %s312_s1, 8192  ;;  %p2787_p4 = scmp.lt.s32.totalorder %s312_s1, %s312_s1 }
  0x95   : > { %p2780_p5 = scmp.ne.s32.totalorder %s312_s1, %s2779_s24  ;;  %p2788_p10 = scmp.lt.s32.totalorder %s2779_s24, %s2779_s24 }
  0x97   : > { %p2782_p7 = pnand %p2780_p5, %p3015_p8  ;;  %p2789_p11 = por %p2788_p10, %p2787_p4 }
  0x99   : > { %p2783_p9 = pneg %p2782_p7 }
  0x9b   : > { %p2790_p12 = pnand %p2789_p11, %p2783_p9 }
  0x9d   : > { %2793 = shalt.err (!%p2790_p12)
}
  0x9e   : > { %2526 = dma.hbm_to_vmem [thread:$0]  (!%p2999_p6), %s3459_s7, 8192, %s312_s1, [#allocation12], %s3476_s13, %s3476_s13, %s3475_s9  }
  0x9f   : > { %s1841_s15 = sadd.s32 4294967294, %s2902_s30   ;;  %s3153_s23 = sadd.s32 1, %s2902_s30  }
  0xa0   : > { %s31_s21 = ssub.s32 %s2902_s30, %s3153_s23  ;;  %s34_s14 = sadd.s32 1, %s2898_s29 }
  0xa1   : > { %p32_p8 = scmp.eq.s32.totalorder %s31_s21, 0  ;;  %p41_p1 = scmp.ne.s32.totalorder %s2898_s29, %s2894_s28 }
  0xa2   : > { %p42_p3 = scmp.eq.s32.totalorder %s2902_s30, 0  ;;  %p47_p13 = scmp.ne.s32.totalorder %s2894_s28, %s2890_s27 }
  0xa3   : > { %s3164_s17 = scalar_select %p32_p8, %s2898_s29, %s34_s14  }
  0xa4   : > { %p3166_p0 = por %p42_p3, %p41_p1  ;;  %p3478_p2 = scmp.eq.s32.totalorder %s2983_s11, 0 }
  0xa5   : > { %p218_p5 = scmp.eq.s32.totalorder %s2983_s11, 1  ;;  %p224_p7 = scmp.eq.s32.totalorder %s1841_s15, 1 }
  0xa6   : > { %p3172_p6 = por %p3478_p2, %p47_p13  ;;  %p2541_p9 = scmp.lt.s32.totalorder %s2902_s30, 2 }
  0xa7   : > { %s325_s10 = sand.u32 1, %s2898_s29   ;;  %p3179_p4 = por %p218_p5, %p41_p1 }
  0xa8   : > { %p3183_p10 = por %p224_p7, %p47_p13  ;;  %s1850_s19 = sshll.u32 %s325_s10, 4 }
  0xa9   : > { %s3480_s16 = scalar_select %p3179_p4, 1, 0 }
  0xaa   : > { %s3481_s18 = scalar_select %p3183_p10, 1, 0 }
  0xab   : > { %s1870_s20 = sshll.u32 %s2902_s30, 8  ;;  %s329_s26 = scalar_lea.vmem [#allocation2], %s1850_s19 }
  0xac   : > { %s3191_s25 = scalar_lea.hbm %s3452_s0, %s1870_s20  ;;  %s336_s15 = sshll.u32 %s329_s26, 4  ;;  %s3193_s15 = int_to_ptr.vmem [resolvable:$true] %s336_s15 }
  0xad   : > { %p3197_p11 = pnand %p2541_p9, %p3166_p0  ;;  %s3201_s14 = scalar_lea.sflag [#allocation3], %s325_s10 }
  0xae   : > { %s2794_s22 = scalar_lea.hbm %s3191_s25, 256  ;;  %s2799_s3 = scalar_lea.hbm %s3452_s0, 512 }
  0xaf   : > { %p2795_p12 = scmp.ne.s32.totalorder %s3191_s25, %s2794_s22  ;;  %p2796_p8 = pneg %p3197_p11 }
  0xb0   : > { %p2800_p13 = scmp.lt.u32.totalorder %s3191_s25, %s3452_s0  ;;  %p2801_p0 = scmp.lt.u32.totalorder %s2799_s3, %s2794_s22 }
  0xb1   : > { %p2797_p1 = pnand %p2796_p8, %p2795_p12  ;;  %p2803_p5 = scmp.lt.u32.totalorder %s2794_s22, %s3191_s25 }
  0xb2   : > { %p2802_p2 = por %p2801_p0, %p2800_p13 }
  0xb3   : > { %p2798_p3 = pneg %p2797_p1 }
  0xb4   : > { %p2804_p7 = por %p2803_p5, %p2802_p2 }
  0xb6   : > { %p2805_p9 = pnand %p2804_p7, %p2798_p3 }
  0xb8   : > { %2808 = shalt.err (!%p2805_p9)
}
  0xb9   : > { %s2809_s10 = scalar_lea.vmem %s3193_s15, 256  ;;  %s2914_s19 = smov [#allocation2]  }
  0xba   : > { %p2810_p12 = scmp.ne.s32.totalorder %s3193_s15, %s2809_s10  ;;  %s2814_s20 = sshll.u32 %s2914_s19, 4  ;;  %s2815_s20 = int_to_ptr.vmem [resolvable:$false] %s2814_s20 }
  0xbb   : > { %s2816_s24 = scalar_lea.vmem %s2815_s20, 512  ;;  %p2817_p4 = scmp.lt.s32.totalorder %s3193_s15, %s2815_s20 }
  0xbc   : > { %p2812_p1 = pnand %p2810_p12, %p2796_p8  ;;  %p2818_p13 = scmp.lt.s32.totalorder %s2816_s24, %s2809_s10 }
  0xbe   : > { %p2813_p10 = pneg %p2812_p1  ;;  %p2819_p0 = por %p2818_p13, %p2817_p4 }
  0xc0   : > { %p2820_p2 = pnand %p2819_p0, %p2813_p10 }
  0xc2   : > { %2823 = shalt.err (!%p2820_p2)
}
  0xc3   : > { %2530 = dma.hbm_to_vmem [thread:$0]  (!%p3197_p11), %s3191_s25, 256, %s3193_s15, %s3201_s14, %s3476_s13, %s3476_s13, %s3475_s9  }
  0xc4   : > { %p3483_p8 = scmp.ne.s32.totalorder %s3470_s12, 0 }
  0xc5   : > { %s3235_s22 = sand.u32 (!%p3483_p8), 1, %s2894_s28  }
  0xc6   : > { %348 = sbr.rel (%p3483_p8) target bundleno = 3051 (0xbeb), region = 52  ;;  %s1854_s3 = sshll.u32 (!%p3483_p8), %s3235_s22, 4 }
  0xc7   : > { %s351_s26 = scalar_lea.sflag (!%p3483_p8), [#allocation3], %s3235_s22  ;;  %s354_s10 = scalar_lea.vmem (!%p3483_p8), [#allocation2], %s1854_s3 }
  0xcd   : > { %2869 = dma.done.wait (%p3172_p6), %s351_s26, 256  }
  0xce   : > { %2871 = vsyncadd (%p3172_p6), %s351_s26, 4294967040  ;;  %p3484_p4 = scmp.eq.s32.totalorder %s2983_s11, 0 }
  0xd0   : > { %2873 = dma.done.wait (%p3484_p4), [#allocation6], 1024   ;;  %p3485_p10 = pmov %p3484_p4 }
  0xd1   : > { %p3486_p11 = pmov %p3484_p4 }
  0xd2   : > { %2875 = vsyncadd (%p3485_p10), [#allocation6], 4294966272 }
  0xd3   : > { %2877 = dma.done.wait (%p3486_p11), [#allocation9], 8448   ;;  %p3487_p3 = pmov %p3484_p4 }
  0xd5   : > { %2879 = vsyncadd (%p3487_p3), [#allocation9], 4294958848  ;;  %p3488_p5 = pmov %p3487_p3 }
  0xd6   : > { %p3489_p7 = pmov %p3487_p3 }
  0xd7   : > { %2881 = dma.done.wait (%p3488_p5), [#allocation12], 16384  }
  0xd8   : > { %2883 = vsyncadd (%p3489_p7), [#allocation12], 4294950912  ;;  %v415_v0 = vld [vmem:[#allocation5] sm:$0xff]  ;;  %v416_v1 = vld [vmem:[#allocation5 + $0x8] sm:$0xff]  ;;  %vm425_vm0 = vcmask 392192   ;;  %v421_v11 = vlaneseq  ;;  %vm910_vm1 = vcmask 130048  }
  0xd9   : > { %v417_v2 = vld [vmem:[#allocation5 + $0x10] sm:$0xff]  ;;  %v2204_v3 = vpack.c.bf16 %v416_v1, %v415_v0  ;;  %v418_v4 = vld [vmem:[#allocation5 + $0x18] sm:$0xff]  ;;  %v419_v6 = vld [vmem:[#allocation5 + $0x20] sm:$0xff]  ;;  %s1861_s13 = sshll.u32 %s3235_s22, 3  ;;  %s1867_s1 = sshll.u32 %s2983_s11, 7 }
  0xda   : > { %v2208_v5 = vpack.c.bf16 %v418_v4, %v417_v2  ;;  %v420_v7 = vld [vmem:[#allocation5 + $0x28] sm:$0xff]  ;;  %v413_v8 = vld [vmem:[%s354_s10] sm:$0xff]  ;;  %v3257_v12 = vshrl.u32 %v421_v11, 7  ;;  %v508_v22 = vld [vmem:[#allocation7 + $0x8] sm:$0xff]  ;;  %s410_s25 = scalar_lea.vmem [#allocation14], %s1861_s13  ;;  %s3408_s19 = scalar_lea.hbm %s3460_s8, %s1867_s1 }
  0xdb   : > { %2205 = vmatprep.subr.bf16.mxu1 %v2204_v3  ;;  %2047 = vmatprep.mubr.msk.f32.mxu1 %vm425_vm0, %v413_v8  ;;  %v2212_v9 = vpack.c.bf16 %v420_v7, %v419_v6  ;;  %v414_v10 = vld [vmem:[%s354_s10 + $0x8] sm:$0xff]  ;;  %v3262_v14 = vld [vmem:[#allocation8] sm:$0xff]  ;;  %v507_v18 = vld [vmem:[#allocation7] sm:$0xff]  ;;  %s1714_s15 = sshll.u32 %s410_s25, 4  ;;  %s1701_s20 = scalar_lea.sflag [#allocation4], %s3235_s22  ;;  %s3410_s15 = int_to_ptr.vmem [resolvable:$true] %s1714_s15 }
  0xdc   : > { %2207 = vmatpush3.bf16.msra.mxu1 %v2204_v3  ;;  %v3260_v13 = vsub.s32 0, %v3257_v12  ;;  %v546_v24 = vld [vmem:[#allocation10] sm:$0xff]  ;;  %v547_v25 = vld [vmem:[#allocation10 + $0x8] sm:$0xff]  ;;  %v548_v29 = vld [vmem:[#allocation10 + $0x10] sm:$0xff]  ;;  %s2824_s24 = scalar_lea.vmem %s3410_s15, 128  ;;  %p3490_p9 = scmp.ne.s32.totalorder %s3480_s16, 0 }
  0xdd   : > { %2209 = vmatprep.subr.bf16.mxu1 %v2208_v5  ;;  %v642_v26 = vld [vmem:[#allocation10 + $0x80] sm:$0xff]  ;;  %v2216_v27 = vpack.c.bf16 %v547_v25, %v546_v24  ;;  %v643_v28 = vld [vmem:[#allocation10 + $0x88] sm:$0xff]  ;;  %v549_v30 = vld [vmem:[#allocation10 + $0x18] sm:$0xff]  ;;  %p2825_p6 = scmp.ne.s32.totalorder %s3410_s15, %s2824_s24  ;;  %s2916_s11 = smov [#allocation14]  }
  0xde   : > { %v424_v15 = vrot.slane %v3262_v14, %v3260_v13  ;;  %v2248_v31 = vpack.c.bf16 %v643_v28, %v642_v26  ;;  %v2220_v32 = vpack.c.bf16 %v549_v30, %v548_v29  ;;  %v644_v33 = vld [vmem:[#allocation10 + $0x90] sm:$0xff]  ;;  %v645_v34 = vld [vmem:[#allocation10 + $0x98] sm:$0xff]  ;;  %v550_v44 = vld [vmem:[#allocation10 + $0x20] sm:$0xff]  ;;  %v3283_v30 = vsub.s32 1, %v3257_v12  ;;  %s2828_s3 = sshll.u32 %s2916_s11, 4  ;;  %s2829_s3 = int_to_ptr.vmem [resolvable:$false] %s2828_s3 }
  0xdf   : > { %v2252_v35 = vpack.c.bf16 %v645_v34, %v644_v33  ;;  %v551_v45 = vld [vmem:[#allocation10 + $0x28] sm:$0xff]  ;;  %v646_v47 = vld [vmem:[#allocation10 + $0xa0] sm:$0xff]  ;;  %v552_v50 = vld [vmem:[#allocation10 + $0x30] sm:$0xff]  ;;  %p2826_p12 = pnand %p2825_p6, %p3490_p9  ;;  %s2830_s26 = scalar_lea.vmem %s2829_s3, 256 }
  0xe0   : > { %2211 = vmatpush3.bf16.msra.mxu1 %v2208_v5  ;;  %2249 = vmatprep.subr.bf16.mxu0 %v2248_v31  ;;  %v2224_v46 = vpack.c.bf16 %v551_v45, %v550_v44  ;;  %v647_v48 = vld [vmem:[#allocation10 + $0xa8] sm:$0xff]  ;;  %v553_v51 = vld [vmem:[#allocation10 + $0x38] sm:$0xff]  ;;  %v648_v53 = vld [vmem:[#allocation10 + $0xb0] sm:$0xff]  ;;  %p2831_p13 = scmp.lt.s32.totalorder %s3410_s15, %s2829_s3  ;;  %p2832_p0 = scmp.lt.s32.totalorder %s2830_s26, %s2824_s24 }
  0xe1   : > { %2213 = vmatprep.subr.bf16.mxu1 %v2212_v9  ;;  %2251 = vmatpush3.bf16.msra.mxu0 %v2248_v31  ;;  %v2256_v49 = vpack.c.bf16 %v647_v48, %v646_v47  ;;  %v2228_v52 = vpack.c.bf16 %v553_v51, %v552_v50  ;;  %v649_v54 = vld [vmem:[#allocation10 + $0xb8] sm:$0xff]  ;;  %v554_v56 = vld [vmem:[#allocation10 + $0x40] sm:$0xff]  ;;  %v555_v57 = vld [vmem:[#allocation10 + $0x48] sm:$0xff]  ;;  %v3286_v31 = vsub.s32 2, %v3257_v12  ;;  %p2827_p1 = pneg %p2826_p12 }
  0xe2   : > { %2253 = vmatprep.subr.bf16.mxu0 %v2252_v35  ;;  %v2260_v55 = vpack.c.bf16 %v649_v54, %v648_v53  ;;  %v2232_v58 = vpack.c.bf16 %v555_v57, %v554_v56  ;;  %v650_v59 = vld [vmem:[#allocation10 + $0xc0] sm:$0xff]  ;;  %v651_v60 = vld [vmem:[#allocation10 + $0xc8] sm:$0xff]  ;;  %v556_v62 = vld [vmem:[#allocation10 + $0x50] sm:$0xff]  ;;  %p2833_p2 = por %p2832_p0, %p2831_p13 }
  0xe3   : > { %v2264_v61 = vpack.c.bf16 %v651_v60, %v650_v59  ;;  %v557_v63 = vld [vmem:[#allocation10 + $0x58] sm:$0xff]  ;;  %v652_v0 = vld [vmem:[#allocation10 + $0xd0] sm:$0xff]  ;;  %v558_v3 = vld [vmem:[#allocation10 + $0x60] sm:$0xff] }
  0xe4   : > { %2215 = vmatpush3.bf16.msra.mxu1 %v2212_v9  ;;  %v2236_v1 = vpack.c.bf16 %v557_v63, %v556_v62  ;;  %v653_v2 = vld [vmem:[#allocation10 + $0xd8] sm:$0xff]  ;;  %v559_v4 = vld [vmem:[#allocation10 + $0x68] sm:$0xff]  ;;  %v654_v7 = vld [vmem:[#allocation10 + $0xe0] sm:$0xff]  ;;  %v660_v63 = vsub.s32 4, %v3257_v12  ;;  %p2834_p8 = pnand %p2833_p2, %p2827_p1 }
  0xe5   : > { %2217 = vmatprep.subr.bf16.mxu1 %v2216_v27  ;;  %2255 = vmatpush3.bf16.msra.mxu0 %v2252_v35  ;;  %v2268_v5 = vpack.c.bf16 %v653_v2, %v652_v0  ;;  %v2240_v6 = vpack.c.bf16 %v559_v4, %v558_v3  ;;  %v655_v8 = vld [vmem:[#allocation10 + $0xe8] sm:$0xff]  ;;  %v561_v11 = vld [vmem:[#allocation10 + $0x78] sm:$0xff]  ;;  %v543_v35 = vrot.slane %v3262_v14, %v3286_v31  ;;  %v742_v47 = vld [vmem:[#allocation10 + $0x120] sm:$0xff]  ;;  %v3296_v0 = vsub.s32 3, %v3257_v12 }
  0xe6   : > { %2257 = vmatprep.subr.bf16.mxu0 %v2256_v49  ;;  %v2272_v9 = vpack.c.bf16 %v655_v8, %v654_v7  ;;  %v743_v48 = vld [vmem:[#allocation10 + $0x128] sm:$0xff]  ;;  %v745_v50 = vld [vmem:[#allocation10 + $0x138] sm:$0xff]  ;;  %v746_v51 = vld [vmem:[#allocation10 + $0x140] sm:$0xff] }
  0xe7   : > { %2048 = vmatmul.mubr.msk.f32.vlgmr.msra.gmra.mrb[0].mxu1 %vm425_vm0, %v414_v10  ;;  %v560_v10 = vld [vmem:[#allocation10 + $0x70] sm:$0xff]  ;;  %v750_v57 = vld [vmem:[#allocation10 + $0x160] sm:$0xff]  ;;  %v565_v2 = vrot.slane %v3262_v14, %v3296_v0 }
  0xe8   : > { %2219 = vmatpush3.bf16.msra.mxu1 %v2216_v27  ;;  %v748_v54 = vld [vmem:[#allocation10 + $0x150] sm:$0xff] }
  0xe9   : > { %2221 = vmatprep.subr.bf16.mxu1 %v2220_v32  ;;  %2259 = vmatpush3.bf16.msra.mxu0 %v2256_v49  ;;  %v744_v49 = vld [vmem:[#allocation10 + $0x130] sm:$0xff] }
  0xea   : > { %2261 = vmatprep.subr.bf16.mxu0 %v2260_v55  ;;  %v752_v60 = vld [vmem:[#allocation10 + $0x170] sm:$0xff] }
  0xec   : > { %2223 = vmatpush3.bf16.msra.mxu1 %v2220_v32  ;;  %v537_v32 = vrot.slane %v3262_v14, %v3283_v30 }
  0xed   : > { %2225 = vmatprep.subr.bf16.mxu1 %v2224_v46  ;;  %2263 = vmatpush3.bf16.msra.mxu0 %v2260_v55  ;;  %v749_v55 = vld [vmem:[#allocation10 + $0x158] sm:$0xff] }
  0xee   : > { %2265 = vmatprep.subr.bf16.mxu0 %v2264_v61  ;;  %v2300_v56 = vpack.c.bf16 %v749_v55, %v748_v54  ;;  %v1019_v54 = vld [vmem:[#allocation10 + $0x1a0] sm:$0xff]  ;;  %v1020_v55 = vld [vmem:[#allocation10 + $0x1a8] sm:$0xff] }
  0xf0   : > { %2227 = vmatpush3.bf16.msra.mxu1 %v2224_v46 }
  0xf1   : > { %2229 = vmatprep.subr.bf16.mxu1 %v2228_v52  ;;  %2267 = vmatpush3.bf16.msra.mxu0 %v2264_v61  ;;  %v753_v61 = vld [vmem:[#allocation10 + $0x178] sm:$0xff] }
  0xf2   : > { %2269 = vmatprep.subr.bf16.mxu0 %v2268_v5  ;;  %v2308_v62 = vpack.c.bf16 %v753_v61, %v752_v60  ;;  %v1023_v60 = vld [vmem:[#allocation10 + $0x1c0] sm:$0xff]  ;;  %v1024_v61 = vld [vmem:[#allocation10 + $0x1c8] sm:$0xff] }
  0xf4   : > { %2231 = vmatpush3.bf16.msra.mxu1 %v2228_v52  ;;  %v747_v52 = vld [vmem:[#allocation10 + $0x148] sm:$0xff] }
  0xf5   : > { %2233 = vmatprep.subr.bf16.mxu1 %v2232_v58  ;;  %2271 = vmatpush3.bf16.msra.mxu0 %v2268_v5  ;;  %v2296_v53 = vpack.c.bf16 %v747_v52, %v746_v51 }
  0xf6   : > { %2273 = vmatprep.subr.bf16.mxu0 %v2272_v9 }
  0xf8   : > { %2235 = vmatpush3.bf16.msra.mxu1 %v2232_v58  ;;  %v751_v58 = vld [vmem:[#allocation10 + $0x168] sm:$0xff] }
  0xf9   : > { %2237 = vmatprep.subr.bf16.mxu1 %v2236_v1  ;;  %2275 = vmatpush3.bf16.msra.mxu0 %v2272_v9  ;;  %v2304_v59 = vpack.c.bf16 %v751_v58, %v750_v57  ;;  %v1021_v57 = vld [vmem:[#allocation10 + $0x1b0] sm:$0xff]  ;;  %v1022_v58 = vld [vmem:[#allocation10 + $0x1b8] sm:$0xff] }
  0xfc   : > { %2239 = vmatpush3.bf16.msra.mxu1 %v2236_v1  ;;  %v661_v1 = vrot.slane %v3262_v14, %v660_v63  ;;  %v1025_v63 = vld [vmem:[#allocation10 + $0x1d0] sm:$0xff] }
  0xfd   : > { %2241 = vmatprep.subr.bf16.mxu1 %v2240_v6 }
 0x100   : > { %2243 = vmatpush3.bf16.msra.mxu1 %v2240_v6 }
 0x1ba   : > { %v2049_v16 = vpop.f32.mrb[0].mxu1 }
 0x1bb   : > { %v498_v17 = vpop.f32.mrb[1].mxu1  ;;  %v504_v20 = vadd.f32 %v2049_v16, %v424_v15  ;;  %v656_v16 = vld [vmem:[#allocation10 + $0xf0] sm:$0xff] }
 0x1bc   : > { %v499_v19 = vadd.f32 %v498_v17, %v424_v15  ;;  %v2244_v15 = vpack.c.bf16 %v561_v11, %v560_v10  ;;  %v657_v17 = vld [vmem:[#allocation10 + $0xf8] sm:$0xff] }
 0x1bd   : > { %v3269_v23 = vadd.f32 %v508_v22, %v504_v20  ;;  %v739_v20 = vld [vmem:[#allocation10 + $0x108] sm:$0xff] }
 0x1be   : > { %v3266_v21 = vadd.f32 %v507_v18, %v499_v19  ;;  %2245 = vmatprep.subr.bf16.mxu1 %v2244_v15  ;;  %v2276_v18 = vpack.c.bf16 %v657_v17, %v656_v16  ;;  %v738_v19 = vld [vmem:[#allocation10 + $0x100] sm:$0xff] }
 0x1bf   : > { %2247 = vmatpush3.bf16.msra.mxu1 %v2244_v15  ;;  %v2280_v22 = vpack.c.bf16 %v739_v20, %v738_v19  ;;  %v756_v15 = vsub.s32 5, %v3257_v12 }
 0x1c0   : > { %511 = vadd.xlane.f32.xlu0 %v3266_v21  ;;  %2277 = vmatprep.subr.bf16.mxu0 %v2276_v18 }
 0x1c1   : > { %2279 = vmatpush3.bf16.msra.mxu0 %v2276_v18  ;;  %2281 = vmatprep.subr.bf16.mxu1 %v2280_v22  ;;  %v757_v16 = vrot.slane %v3262_v14, %v756_v15 }
 0x1c4   : > { %513 = vadd.xlane.f32.xlu0 %v3269_v23 }
 0x24d   : > { %v512_v36 = vpop.xlane.xlu0 %511 }
 0x24e   : > { %v516_v37 = vmul.f32 0.0078125, %v512_v36 }
 0x250   : > { %v3273_v38 = vsub.f32 %v3266_v21, %v516_v37 }
 0x251   : > { %v514_v39 = vpop.xlane.xlu0 %513 }
 0x252   : > { %v517_v40 = vmul.f32 0.0078125, %v514_v39  ;;  %v520_v41 = vmul.f32 %v3273_v38, %v3273_v38 }
 0x254   : > { %v3278_v42 = vsub.f32 %v3269_v23, %v517_v40  ;;  %522 = vadd.xlane.f32.xlu1 %v520_v41  ;;  %v740_v41 = vld [vmem:[#allocation10 + $0x110] sm:$0xff] }
 0x256   : > { %v521_v43 = vmul.f32 %v3278_v42, %v3278_v42 }
 0x258   : > { %524 = vadd.xlane.f32.xlu1 %v521_v43  ;;  %v741_v43 = vld [vmem:[#allocation10 + $0x118] sm:$0xff] }
 0x259   : > { %v2284_v46 = vpack.c.bf16 %v741_v43, %v740_v41 }
 0x2e1   : > { %v523_v24 = vpop.xlane.xlu1 %522 }
 0x2e2   : > { %v526_v25 = vmul.f32 0.0078125, %v523_v24 }
 0x2e4   : > { %v528_v26 = vadd.f32 1e-06, %v526_v25 }
 0x2e5   : > { %v525_v27 = vpop.xlane.xlu1 %524 }
 0x2e6   : > { %2592 = vrsqrt.f32 %v528_v26  ;;  %v527_v28 = vmul.f32 0.0078125, %v525_v27 }
 0x2e8   : > { %v529_v29 = vadd.f32 1e-06, %v527_v28 }
 0x2ea   : > { %2594 = vrsqrt.f32 %v529_v29 }
 0x2f0   : > { %v2593_v33 = vpop.eup %2592 }
 0x2f1   : > { %v532_v34 = vmul.f32 %v2593_v33, %v3273_v38  ;;  %v2288_v38 = vpack.c.bf16 %v743_v48, %v742_v47 }
 0x2f3   : > { %v538_v36 = vmul.f32 %v537_v32, %v532_v34 }
 0x2f4   : > { %v2595_v37 = vpop.eup %2594 }
 0x2f5   : > { %v544_v39 = vadd.f32 %v543_v35, %v538_v36  ;;  %v533_v40 = vmul.f32 %v2595_v37, %v3278_v42  ;;  %v2292_v42 = vpack.c.bf16 %v745_v50, %v744_v49  ;;  %v1017_v49 = vld [vmem:[#allocation10 + $0x190] sm:$0xff]  ;;  %v1018_v50 = vld [vmem:[#allocation10 + $0x198] sm:$0xff] }
 0x2f7   : > { %2082 = vmatprep.mubr.f32.mxu1 %v544_v39  ;;  %2117 = vmatprep.mubr.f32.mxu0 %v544_v39  ;;  %v539_v44 = vmul.f32 %v537_v32, %v533_v40 }
 0x2f9   : > { %v545_v45 = vadd.f32 %v543_v35, %v539_v44  ;;  %v1015_v44 = vld [vmem:[#allocation10 + $0x180] sm:$0xff] }
 0x2fb   : > { %2083 = vmatmul.mubr.f32.vlgmr.msra.gmra.mrb[2].mxu1 %v545_v45  ;;  %2118 = vmatmul.mubr.f32.vlgmr.msra.gmra.mrb[0].mxu0 %v545_v45 }
 0x2fc   : > { %2283 = vmatpush3.bf16.msra.mxu1 %v2280_v22  ;;  %2152 = vmatprep.mubr.f32.mxu1 %v544_v39 }
 0x2fd   : > { %2285 = vmatprep.subr.bf16.mxu1 %v2284_v46 }
 0x300   : > { %2287 = vmatpush3.bf16.msra.mxu1 %v2284_v46 }
 0x301   : > { %2289 = vmatprep.subr.bf16.mxu1 %v2288_v38 }
 0x304   : > { %2291 = vmatpush3.bf16.msra.mxu1 %v2288_v38 }
 0x305   : > { %2293 = vmatprep.subr.bf16.mxu1 %v2292_v42 }
 0x308   : > { %2295 = vmatpush3.bf16.msra.mxu1 %v2292_v42 }
 0x309   : > { %2297 = vmatprep.subr.bf16.mxu1 %v2296_v53 }
 0x30c   : > { %2299 = vmatpush3.bf16.msra.mxu1 %v2296_v53  ;;  %v2324_v53 = vpack.c.bf16 %v1018_v50, %v1017_v49  ;;  %v1169_v49 = vld [vmem:[#allocation11 + $0xa8] sm:$0xff] }
 0x30d   : > { %2301 = vmatprep.subr.bf16.mxu1 %v2300_v56 }
 0x310   : > { %2303 = vmatpush3.bf16.msra.mxu1 %v2300_v56  ;;  %v2328_v56 = vpack.c.bf16 %v1020_v55, %v1019_v54  ;;  %v1168_v55 = vld [vmem:[#allocation11 + $0xa0] sm:$0xff] }
 0x311   : > { %2305 = vmatprep.subr.bf16.mxu1 %v2304_v59 }
 0x314   : > { %2307 = vmatpush3.bf16.msra.mxu1 %v2304_v59  ;;  %v2332_v59 = vpack.c.bf16 %v1022_v58, %v1021_v57  ;;  %v1170_v57 = vld [vmem:[#allocation11 + $0xb0] sm:$0xff] }
 0x315   : > { %2309 = vmatprep.subr.bf16.mxu1 %v2308_v62 }
 0x318   : > { %2311 = vmatpush3.bf16.msra.mxu1 %v2308_v62  ;;  %v2336_v62 = vpack.c.bf16 %v1024_v61, %v1023_v60 }
 0x31b   : > { %2153 = vmatmul.mubr.f32.vlgmr.msra.gmra.mrb[4].mxu1 %v545_v45  ;;  %v1016_v45 = vld [vmem:[#allocation10 + $0x188] sm:$0xff] }
 0x31c   : > { %v2320_v46 = vpack.c.bf16 %v1016_v45, %v1015_v44  ;;  %v1156_v44 = vld [vmem:[#allocation11 + $0x40] sm:$0xff] }
 0x31d   : > { %v1160_v45 = vld [vmem:[#allocation11 + $0x60] sm:$0xff] }
 0x3ce   : > { %v2084_v3 = vpop.f32.mrb[2].mxu1  ;;  %v2119_v4 = vpop.f32.mrb[0].mxu0 }
 0x3cf   : > { %v734_v5 = vadd.f32 %v2119_v4, %v661_v1  ;;  %v632_v6 = vpop.f32.mrb[3].mxu1  ;;  %v728_v7 = vpop.f32.mrb[1].mxu0  ;;  %v638_v11 = vadd.f32 %v2084_v3, %v565_v2  ;;  %v1027_v3 = vld [vmem:[#allocation10 + $0x1e0] sm:$0xff]  ;;  %v1028_v4 = vld [vmem:[#allocation10 + $0x1e8] sm:$0xff] }
 0x3d0   : > { %v633_v8 = vadd.f32 %v632_v6, %v565_v2  ;;  %v729_v9 = vadd.f32 %v728_v7, %v661_v1  ;;  %v1026_v1 = vld [vmem:[#allocation10 + $0x1d8] sm:$0xff]  ;;  %v1029_v6 = vld [vmem:[#allocation10 + $0x1f0] sm:$0xff] }
 0x3d1   : > { %v2340_v2 = vpack.c.bf16 %v1026_v1, %v1025_v63  ;;  %v1030_v7 = vld [vmem:[#allocation10 + $0x1f8] sm:$0xff] }
 0x3d2   : > { %v2312_v10 = vpack.c.bf16 %v734_v5, %v729_v9  ;;  %2159 = vmatprep.mubr.f32.mxu0 %v633_v8  ;;  %v2344_v5 = vpack.c.bf16 %v1028_v4, %v1027_v3  ;;  %v2348_v8 = vpack.c.bf16 %v1030_v7, %v1029_v6  ;;  %v1177_v6 = vld [vmem:[#allocation11 + $0xe8] sm:$0xff]  ;;  %v1175_v7 = vld [vmem:[#allocation11 + $0xd8] sm:$0xff] }
 0x3d4   : > { %2313 = vmatprep.subr.bf16.mxu0 %v2312_v10 }
 0x3d5   : > { %2315 = vmatpush3.bf16.xpose.msra.mxu0 %v2312_v10 }
 0x3dc   : > { %2160 = vmatmul.mubr.f32.vlgmr.msra.gmra.mrb[2].mxu0 %v638_v11  ;;  %v1110_v11 = vsub.s32 6, %v3257_v12 }
 0x3ee   : > { %v2154_v17 = vpop.f32.mrb[4].mxu1 }
 0x3ef   : > { %v830_v18 = vadd.f32 %v2154_v17, %v757_v16  ;;  %v824_v19 = vpop.f32.mrb[5].mxu1 }
 0x3f0   : > { %v825_v20 = vadd.f32 %v824_v19, %v757_v16  ;;  %v1111_v16 = vrot.slane %v3262_v14, %v1110_v11  ;;  %v1176_v11 = vld [vmem:[#allocation11 + $0xe0] sm:$0xff] }
 0x3f2   : > { %v2316_v22 = vpack.c.bf16 %v830_v18, %v825_v20 }
 0x3f4   : > { %2317 = vmatprep.subr.bf16.mxu0 %v2316_v22 }
 0x3f5   : > { %2319 = vmatpush3.bf16.msra.mxu0 %v2316_v22 }
 0x3f6   : > { %2321 = vmatprep.subr.bf16.mxu0 %v2320_v46 }
 0x4af   : > { %v2161_v24 = vpop.f32.mrb[2].mxu0 }
 0x4b0   : > { %v909_v25 = vmul.f32 0.088388346, %v2161_v24  ;;  %v899_v26 = vpop.f32.mrb[3].mxu0  ;;  %v1149_v24 = vld [vmem:[#allocation11 + $0x8] sm:$0xff] }
 0x4b1   : > { %v908_v27 = vmul.f32 0.088388346, %v899_v26  ;;  %v1151_v26 = vld [vmem:[#allocation11 + $0x18] sm:$0xff] }
 0x4b2   : > { %v914_v28 = vsel %vm910_vm1, %v909_v25, -inf }
 0x4b3   : > { %915 = vmax.xlane.f32.xlu1 %v914_v28  ;;  %v911_v29 = vsel %vm910_vm1, %v908_v27, -inf  ;;  %v1155_v28 = vld [vmem:[#allocation11 + $0x38] sm:$0xff] }
 0x4b4   : > { %912 = vmax.xlane.f32.xlu0 %v911_v29  ;;  %v1148_v29 = vld [vmem:[#allocation11] sm:$0xff] }
 0x540   : > { %v916_v32 = vpop.xlane.xlu1 %915 }
 0x541   : > { %v918_v33 = vsub.f32 %v909_v25, %v916_v32  ;;  %v913_v34 = vpop.xlane.xlu0 %912  ;;  %v1153_v25 = vld [vmem:[#allocation11 + $0x28] sm:$0xff]  ;;  %v1152_v32 = vld [vmem:[#allocation11 + $0x20] sm:$0xff] }
 0x542   : > { %v917_v35 = vsub.f32 %v908_v27, %v913_v34  ;;  %v2352_v27 = vpack.c.bf16 %v1153_v25, %v1149_v24  ;;  %v2354_v34 = vpack.c.bf16 %v1152_v32, %v1148_v29  ;;  %v1185_v24 = vld [vmem:[#allocation11 + $0x128] sm:$0xff]  ;;  %v1183_v25 = vld [vmem:[#allocation11 + $0x118] sm:$0xff]  ;;  %v1184_v29 = vld [vmem:[#allocation11 + $0x120] sm:$0xff] }
 0x543   : > { %v921_v36 = vmul.f32 1.442695, %v918_v33  ;;  %v2384_v33 = vpack.c.bf16 %v1155_v28, %v1151_v26  ;;  %v1180_v28 = vld [vmem:[#allocation11 + $0x100] sm:$0xff] }
 0x544   : > { %v919_v37 = vmul.f32 1.442695, %v917_v35  ;;  %v1150_v35 = vld [vmem:[#allocation11 + $0x10] sm:$0xff]  ;;  %2353 = vmatprep.subr.bf16.mxu1 %v2352_v27  ;;  %v1187_v27 = vld [vmem:[#allocation11 + $0x138] sm:$0xff] }
 0x545   : > { %2596 = vpow2.f32 %v921_v36  ;;  %v1154_v36 = vld [vmem:[#allocation11 + $0x30] sm:$0xff]  ;;  %2355 = vmatpush1.bf16.msra.mxu1 %v2354_v34  ;;  %v2400_v32 = vpack.c.bf16 %v1187_v27, %v1183_v25 }
 0x546   : > { %2598 = vpow2.f32 %v919_v37  ;;  %v1161_v37 = vld [vmem:[#allocation11 + $0x68] sm:$0xff]  ;;  %v1182_v34 = vld [vmem:[#allocation11 + $0x110] sm:$0xff] }
 0x54f   : > { %v2597_v39 = vpop.eup %2596 }
 0x550   : > { %v2599_v40 = vpop.eup %2598  ;;  %v926_v41 = vsel %vm910_vm1, %v2597_v39, 0.0 }
 0x551   : > { %927 = vadd.xlane.f32.xlu1 %v926_v41  ;;  %v923_v43 = vsel %vm910_vm1, %v2599_v40, 0.0 }
 0x552   : > { %924 = vadd.xlane.f32.xlu0 %v923_v43 }
 0x5de   : > { %v928_v47 = vpop.xlane.xlu1 %927 }
 0x5df   : > { %2600 = vrcp.f32 %v928_v47  ;;  %v925_v48 = vpop.xlane.xlu0 %924  ;;  %v2358_v47 = vpack.c.bf16 %v1160_v45, %v1156_v44 }
 0x5e0   : > { %2602 = vrcp.f32 %v925_v48  ;;  %v1162_v48 = vld [vmem:[#allocation11 + $0x70] sm:$0xff] }
 0x5e9   : > { %v2601_v38 = vpop.eup %2600 }
 0x5ea   : > { %v2603_v42 = vpop.eup %2602  ;;  %v932_v52 = vmul.f32 %v2601_v38, %v2597_v39  ;;  %v1159_v39 = vld [vmem:[#allocation11 + $0x58] sm:$0xff]  ;;  %v1165_v38 = vld [vmem:[#allocation11 + $0x88] sm:$0xff] }
 0x5eb   : > { %v931_v51 = vmul.f32 %v2603_v42, %v2599_v40  ;;  %v1163_v40 = vld [vmem:[#allocation11 + $0x78] sm:$0xff]  ;;  %v2360_v42 = vpack.c.bf16 %v1169_v49, %v1165_v38  ;;  %v2915_v38 = vmov 0.0  }
 0x5ec   : > { %v2388_v43 = vpack.c.bf16 %v1163_v40, %v1159_v39  ;;  %v1195_v40 = vld [vmem:[#allocation11 + $0x178] sm:$0xff]  ;;  %1298 = vmatprep.mubr.f32.mxu1 %v2915_v38 }
 0x5ed   : > { %2166 = vmatprep.mubr.msk.f32.mxu0 %vm910_vm1, %v931_v51  ;;  %v1167_v51 = vld [vmem:[#allocation11 + $0x98] sm:$0xff] }
 0x5ee   : > { %2167 = vmatmul.mubr.msk.f32.vlgmr.msra.gmra.mrb[4].mxu0 %vm910_vm1, %v932_v52  ;;  %v1171_v52 = vld [vmem:[#allocation11 + $0xb8] sm:$0xff] }
 0x5ef   : > { %2323 = vmatpush3.bf16.msra.mxu0 %v2320_v46  ;;  %v1158_v46 = vld [vmem:[#allocation11 + $0x50] sm:$0xff]  ;;  %v2392_v54 = vpack.c.bf16 %v1171_v52, %v1167_v51  ;;  %v1203_v51 = vld [vmem:[#allocation11 + $0x1b8] sm:$0xff] }
 0x5f0   : > { %2325 = vmatprep.subr.bf16.mxu0 %v2324_v53  ;;  %v2390_v50 = vpack.c.bf16 %v1162_v48, %v1158_v46  ;;  %v1190_v46 = vld [vmem:[#allocation11 + $0x150] sm:$0xff]  ;;  %v1197_v48 = vld [vmem:[#allocation11 + $0x188] sm:$0xff] }
 0x5f3   : > { %2327 = vmatpush3.bf16.msra.mxu0 %v2324_v53  ;;  %v1164_v53 = vld [vmem:[#allocation11 + $0x80] sm:$0xff] }
 0x5f4   : > { %2329 = vmatprep.subr.bf16.mxu0 %v2328_v56  ;;  %v2362_v58 = vpack.c.bf16 %v1168_v55, %v1164_v53  ;;  %v1200_v55 = vld [vmem:[#allocation11 + $0x1a0] sm:$0xff] }
 0x5f7   : > { %2331 = vmatpush3.bf16.msra.mxu0 %v2328_v56  ;;  %v1166_v56 = vld [vmem:[#allocation11 + $0x90] sm:$0xff] }
 0x5f8   : > { %2333 = vmatprep.subr.bf16.mxu0 %v2332_v59 }
 0x5fb   : > { %2335 = vmatpush3.bf16.msra.mxu0 %v2332_v59  ;;  %v2394_v59 = vpack.c.bf16 %v1170_v57, %v1166_v56  ;;  %v1198_v56 = vld [vmem:[#allocation11 + $0x190] sm:$0xff] }
 0x5fc   : > { %2337 = vmatprep.subr.bf16.mxu0 %v2336_v62 }
 0x5ff   : > { %2339 = vmatpush3.bf16.msra.mxu0 %v2336_v62 }
 0x600   : > { %2341 = vmatprep.subr.bf16.mxu0 %v2340_v2 }
 0x603   : > { %2343 = vmatpush3.bf16.msra.mxu0 %v2340_v2 }
 0x604   : > { %2345 = vmatprep.subr.bf16.mxu0 %v2344_v5 }
 0x607   : > { %2347 = vmatpush3.bf16.msra.mxu0 %v2344_v5  ;;  %v1173_v5 = vld [vmem:[#allocation11 + $0xc8] sm:$0xff] }
 0x608   : > { %2349 = vmatprep.subr.bf16.mxu0 %v2348_v8 }
 0x60b   : > { %2351 = vmatpush3.bf16.msra.mxu0 %v2348_v8  ;;  %v2364_v8 = vpack.c.bf16 %v1177_v6, %v1173_v5  ;;  %v1208_v6 = vld [vmem:[#allocation11 + $0x1e0] sm:$0xff] }
 0x60c   : > { %2385 = vmatprep.subr.bf16.mxu0 %v2384_v33  ;;  %v2370_v33 = vpack.c.bf16 %v1184_v29, %v1180_v28 }
 0x6c1   : > { %v2168_v9 = vpop.f32.mrb[4].mxu0 }
 0x6c2   : > { %v1005_v10 = vpop.f32.mrb[5].mxu0 }
 0x6c3   : > { %2201 = vmatprep.mubr.f32.mxu0 %v1005_v10  ;;  %v1172_v10 = vld [vmem:[#allocation11 + $0xc0] sm:$0xff] }
 0x6c4   : > { %2202 = vmatmul.mubr.f32.vlgmr.msra.gmra.mrb[6].mxu0 %v2168_v9  ;;  %v1179_v9 = vld [vmem:[#allocation11 + $0xf8] sm:$0xff] }
 0x6c5   : > { %1375 = vmatprep.mubr.f32.mxu0 %v2915_v38 }
 0x797   : > { %v2203_v15 = vpop.f32.mrb[6].mxu0 }
 0x798   : > { %v1097_v17 = vpop.f32.mrb[7].mxu0  ;;  %v1107_v19 = vadd.f32 %v2203_v15, %v3269_v23  ;;  %v2386_v23 = vpack.c.bf16 %v1154_v36, %v1150_v35  ;;  %v2396_v15 = vpack.c.bf16 %v1179_v9, %v1175_v7  ;;  %v1186_v35 = vld [vmem:[#allocation11 + $0x130] sm:$0xff] }
 0x799   : > { %v1106_v18 = vadd.f32 %v1097_v17, %v3266_v21  ;;  %v1157_v21 = vld [vmem:[#allocation11 + $0x48] sm:$0xff]  ;;  %v1174_v17 = vld [vmem:[#allocation11 + $0xd0] sm:$0xff]  ;;  %v2402_v36 = vpack.c.bf16 %v1186_v35, %v1182_v34 }
 0x79a   : > { %v1113_v22 = vadd.f32 %v1111_v16, %v1107_v19  ;;  %v2356_v41 = vpack.c.bf16 %v1161_v37, %v1157_v21  ;;  %2387 = vmatpush1.bf16.msra.mxu0 %v2386_v23  ;;  %v1189_v21 = vld [vmem:[#allocation11 + $0x148] sm:$0xff]  ;;  %v1191_v37 = vld [vmem:[#allocation11 + $0x158] sm:$0xff]  ;;  %v1206_v7 = vld [vmem:[#allocation11 + $0x1d0] sm:$0xff] }
 0x79b   : > { %v3313_v20 = vadd.f32 %v1111_v16, %v1106_v18  ;;  %2389 = vmatprep.subr.bf16.mxu0 %v2388_v43  ;;  %v2366_v16 = vpack.c.bf16 %v1176_v11, %v1172_v10  ;;  %v1178_v18 = vld [vmem:[#allocation11 + $0xf0] sm:$0xff]  ;;  %v1193_v23 = vld [vmem:[#allocation11 + $0x168] sm:$0xff]  ;;  %v1192_v43 = vld [vmem:[#allocation11 + $0x160] sm:$0xff]  ;;  %v2404_v44 = vpack.c.bf16 %v1195_v40, %v1191_v37 }
 0x79c   : > { %2357 = vmatprep.subr.bf16.mxu1 %v2356_v41  ;;  %v2398_v19 = vpack.c.bf16 %v1178_v18, %v1174_v17  ;;  %v2372_v39 = vpack.c.bf16 %v1193_v23, %v1189_v21  ;;  %v1188_v41 = vld [vmem:[#allocation11 + $0x140] sm:$0xff]  ;;  %v1509_v23 = vld [vmem:[#allocation13 + $0x188] sm:$0xff] }
 0x79d   : > { %1114 = vadd.xlane.f32.xlu0 %v3313_v20  ;;  %2359 = vmatpush1.bf16.msra.mxu1 %v2358_v47  ;;  %v2374_v45 = vpack.c.bf16 %v1192_v43, %v1188_v41  ;;  %v1194_v47 = vld [vmem:[#allocation11 + $0x170] sm:$0xff]  ;;  %v1508_v21 = vld [vmem:[#allocation13 + $0x180] sm:$0xff] }
 0x79e   : > { %2391 = vmatpush1.bf16.msra.mxu0 %v2390_v50  ;;  %2361 = vmatprep.subr.bf16.mxu1 %v2360_v42  ;;  %v2406_v49 = vpack.c.bf16 %v1194_v47, %v1190_v46  ;;  %v1201_v50 = vld [vmem:[#allocation11 + $0x1a8] sm:$0xff]  ;;  %v1199_v42 = vld [vmem:[#allocation11 + $0x198] sm:$0xff]  ;;  %v1460_v37 = vld [vmem:[#allocation13] sm:$0xff]  ;;  %v2448_v40 = vpack.c.bf16 %v1509_v23, %v1508_v21 }
 0x79f   : > { %2393 = vmatprep.subr.bf16.mxu0 %v2392_v54  ;;  %v2376_v52 = vpack.c.bf16 %v1201_v50, %v1197_v48  ;;  %v2408_v53 = vpack.c.bf16 %v1203_v51, %v1199_v42  ;;  %v1196_v54 = vld [vmem:[#allocation11 + $0x180] sm:$0xff]  ;;  %v1479_v46 = vld [vmem:[#allocation13 + $0x98] sm:$0xff]  ;;  %v1510_v47 = vld [vmem:[#allocation13 + $0x190] sm:$0xff] }
 0x7a0   : > { %v2378_v57 = vpack.c.bf16 %v1200_v55, %v1196_v54  ;;  %v1492_v43 = vld [vmem:[#allocation13 + $0x100] sm:$0xff]  ;;  %v1463_v50 = vld [vmem:[#allocation13 + $0x18] sm:$0xff]  ;;  %v1486_v21 = vld [vmem:[#allocation13 + $0xd0] sm:$0xff] }
 0x7a1   : > { %1116 = vadd.xlane.f32.xlu0 %v1113_v22  ;;  %2363 = vmatpush1.bf16.msra.mxu1 %v2362_v58  ;;  %v1202_v58 = vld [vmem:[#allocation11 + $0x1b0] sm:$0xff]  ;;  %v1480_v55 = vld [vmem:[#allocation13 + $0xa0] sm:$0xff] }
 0x7a2   : > { %2395 = vmatpush1.bf16.msra.mxu0 %v2394_v59  ;;  %2365 = vmatprep.subr.bf16.mxu1 %v2364_v8  ;;  %v1205_v59 = vld [vmem:[#allocation11 + $0x1c8] sm:$0xff]  ;;  %v1210_v8 = vld [vmem:[#allocation11 + $0x1f0] sm:$0xff] }
 0x7a3   : > { %2397 = vmatprep.subr.bf16.mxu0 %v2396_v15  ;;  %v2414_v10 = vpack.c.bf16 %v1210_v8, %v1206_v7  ;;  %v1483_v7 = vld [vmem:[#allocation13 + $0xb8] sm:$0xff]  ;;  %v1514_v8 = vld [vmem:[#allocation13 + $0x1b0] sm:$0xff] }
 0x7a4   : > { %v1518_v23 = vld [vmem:[#allocation13 + $0x1d0] sm:$0xff] }
 0x7a5   : > { %2367 = vmatpush1.bf16.msra.mxu1 %v2366_v16 }
 0x7a6   : > { %2399 = vmatpush1.bf16.msra.mxu0 %v2398_v19 }
 0x7a7   : > { %2401 = vmatprep.subr.bf16.mxu0 %v2400_v32 }
 0x7aa   : > { %2403 = vmatpush1.bf16.msra.mxu0 %v2402_v36  ;;  %v1477_v36 = vld [vmem:[#allocation13 + $0x88] sm:$0xff] }
 0x7ab   : > { %2405 = vmatprep.subr.bf16.mxu0 %v2404_v44  ;;  %v1493_v44 = vld [vmem:[#allocation13 + $0x108] sm:$0xff] }
 0x7ae   : > { %2407 = vmatpush1.bf16.msra.mxu0 %v2406_v49  ;;  %v1462_v49 = vld [vmem:[#allocation13 + $0x10] sm:$0xff] }
 0x7af   : > { %2409 = vmatprep.subr.bf16.mxu0 %v2408_v53  ;;  %v2422_v51 = vpack.c.bf16 %v1463_v50, %v1462_v49  ;;  %v1495_v53 = vld [vmem:[#allocation13 + $0x118] sm:$0xff]  ;;  %v1521_v50 = vld [vmem:[#allocation13 + $0x1e8] sm:$0xff] }
 0x82a   : > { %v1115_v60 = vpop.xlane.xlu0 %1114 }
 0x82b   : > { %v1118_v61 = vmul.f32 0.0078125, %v1115_v60  ;;  %v1209_v60 = vld [vmem:[#allocation11 + $0x1e8] sm:$0xff] }
 0x82d   : > { %v3317_v62 = vsub.f32 %v3313_v20, %v1118_v61  ;;  %v2410_v61 = vpack.c.bf16 %v1202_v58, %v1198_v56  ;;  %v1481_v56 = vld [vmem:[#allocation13 + $0xa8] sm:$0xff] }
 0x82e   : > { %v1117_v63 = vpop.xlane.xlu0 %1116  ;;  %v2424_v58 = vpack.c.bf16 %v1481_v56, %v1480_v55  ;;  %v1505_v55 = vld [vmem:[#allocation13 + $0x168] sm:$0xff] }
 0x82f   : > { %v1119_v1 = vmul.f32 0.0078125, %v1117_v63  ;;  %v1122_v2 = vmul.f32 %v3317_v62, %v3317_v62  ;;  %v2380_v63 = vpack.c.bf16 %v1209_v60, %v1205_v59  ;;  %2411 = vmatpush1.bf16.msra.mxu0 %v2410_v61  ;;  %v1513_v59 = vld [vmem:[#allocation13 + $0x1a8] sm:$0xff]  ;;  %v1464_v60 = vld [vmem:[#allocation13 + $0x20] sm:$0xff] }
 0x830   : > { %v1465_v61 = vld [vmem:[#allocation13 + $0x28] sm:$0xff] }
 0x831   : > { %v3321_v3 = vsub.f32 %v1113_v22, %v1119_v1  ;;  %1124 = vadd.xlane.f32.xlu1 %v1122_v2  ;;  %v1181_v22 = vld [vmem:[#allocation11 + $0x108] sm:$0xff]  ;;  %v1207_v1 = vld [vmem:[#allocation11 + $0x1d8] sm:$0xff] }
 0x832   : > { %v2368_v26 = vpack.c.bf16 %v1185_v24, %v1181_v22  ;;  %v1211_v2 = vld [vmem:[#allocation11 + $0x1f8] sm:$0xff]  ;;  %v1138_v22 = vsub.s32 7, %v3257_v12 }
 0x833   : > { %v1123_v4 = vmul.f32 %v3321_v3, %v3321_v3  ;;  %v2412_v5 = vpack.c.bf16 %v1211_v2, %v1207_v1  ;;  %v3326_v24 = vld [vmem:[#allocation8 + $0x8] sm:$0xf]  ;;  %v2426_v1 = vpack.c.bf16 %v1465_v61, %v1464_v60  ;;  %v1496_v2 = vld [vmem:[#allocation13 + $0x120] sm:$0xff] }
 0x834   : > { %2369 = vmatprep.subr.bf16.mxu1 %v2368_v26  ;;  %v1139_v25 = vrot.slane %v3262_v14, %v1138_v22  ;;  %v1145_v28 = vrot.slane %v3326_v24, %v3260_v13  ;;  %v1476_v14 = vld [vmem:[#allocation13 + $0x80] sm:$0xff]  ;;  %v1523_v61 = vld [vmem:[#allocation13 + $0x1f8] sm:$0xff] }
 0x835   : > { %1126 = vadd.xlane.f32.xlu1 %v1123_v4  ;;  %2371 = vmatpush1.bf16.msra.mxu1 %v2370_v33  ;;  %v1204_v4 = vld [vmem:[#allocation11 + $0x1c0] sm:$0xff] }
 0x836   : > { %2373 = vmatprep.subr.bf16.mxu1 %v2372_v39  ;;  %v2382_v9 = vpack.c.bf16 %v1208_v6, %v1204_v4  ;;  %2413 = vmatprep.subr.bf16.mxu0 %v2412_v5  ;;  %v1461_v39 = vld [vmem:[#allocation13 + $0x8] sm:$0xff]  ;;  %v1482_v6 = vld [vmem:[#allocation13 + $0xb0] sm:$0xff] }
 0x837   : > { %2415 = vmatpush1.bf16.msra.mxu0 %v2414_v10  ;;  %v2418_v41 = vpack.c.bf16 %v1461_v39, %v1460_v37  ;;  %v1497_v4 = vld [vmem:[#allocation13 + $0x128] sm:$0xff]  ;;  %v1515_v10 = vld [vmem:[#allocation13 + $0x1b8] sm:$0xff] }
 0x838   : > { %2449 = vmatprep.subr.bf16.mxu0 %v2448_v40  ;;  %v2458_v5 = vpack.c.bf16 %v1497_v4, %v1496_v2  ;;  %v1519_v39 = vld [vmem:[#allocation13 + $0x1d8] sm:$0xff]  ;;  %v1470_v40 = vld [vmem:[#allocation13 + $0x50] sm:$0xff] }
 0x839   : > { %2375 = vmatpush1.bf16.msra.mxu1 %v2374_v45  ;;  %v1478_v45 = vld [vmem:[#allocation13 + $0x90] sm:$0xff] }
 0x83a   : > { %2377 = vmatprep.subr.bf16.mxu1 %v2376_v52  ;;  %v2420_v48 = vpack.c.bf16 %v1479_v46, %v1478_v45  ;;  %v1494_v52 = vld [vmem:[#allocation13 + $0x110] sm:$0xff]  ;;  %v1503_v45 = vld [vmem:[#allocation13 + $0x158] sm:$0xff] }
 0x83b   : > { %v2454_v54 = vpack.c.bf16 %v1495_v53, %v1494_v52 }
 0x83d   : > { %2379 = vmatpush1.bf16.msra.mxu1 %v2378_v57  ;;  %v1512_v57 = vld [vmem:[#allocation13 + $0x1a0] sm:$0xff] }
 0x83e   : > { %2381 = vmatprep.subr.bf16.mxu1 %v2380_v63  ;;  %v2456_v63 = vpack.c.bf16 %v1513_v59, %v1512_v57  ;;  %v1490_v57 = vld [vmem:[#allocation13 + $0xf0] sm:$0xff] }
 0x83f   : > { %v1522_v59 = vld [vmem:[#allocation13 + $0x1f0] sm:$0xff] }
 0x840   : > { %v2476_v2 = vpack.c.bf16 %v1523_v61, %v1522_v59 }
 0x841   : > { %2383 = vmatpush1.bf16.msra.mxu1 %v2382_v9  ;;  %v2428_v9 = vpack.c.bf16 %v1483_v7, %v1482_v6  ;;  %v1507_v6 = vld [vmem:[#allocation13 + $0x178] sm:$0xff] }
 0x8be   : > { %v1125_v11 = vpop.xlane.xlu1 %1124 }
 0x8bf   : > { %v1128_v15 = vmul.f32 0.0078125, %v1125_v11  ;;  %v1466_v11 = vld [vmem:[#allocation13 + $0x30] sm:$0xff] }
 0x8c1   : > { %v1130_v16 = vadd.f32 1e-06, %v1128_v15  ;;  %v1467_v15 = vld [vmem:[#allocation13 + $0x38] sm:$0xff] }
 0x8c2   : > { %v1127_v17 = vpop.xlane.xlu1 %1126 }
 0x8c3   : > { %2604 = vrsqrt.f32 %v1130_v16  ;;  %v1129_v18 = vmul.f32 0.0078125, %v1127_v17  ;;  %v2460_v16 = vpack.c.bf16 %v1515_v10, %v1514_v8  ;;  %v2430_v17 = vpack.c.bf16 %v1467_v15, %v1466_v11  ;;  %v1212_v8 = vld [vmem:[%s3458_s6] sm:$0xf] }
 0x8c4   : > { %v1225_v10 = vrot.slane %v1212_v8, %v3286_v31  ;;  %v1221_v11 = vrot.slane %v1212_v8, %v3283_v30  ;;  %v1229_v15 = vrot.slane %v1212_v8, %v3296_v0 }
 0x8c5   : > { %v1131_v19 = vadd.f32 1e-06, %v1129_v18  ;;  %v1498_v18 = vld [vmem:[#allocation13 + $0x130] sm:$0xff] }
 0x8c7   : > { %2606 = vrsqrt.f32 %v1131_v19  ;;  %v1499_v19 = vld [vmem:[#allocation13 + $0x138] sm:$0xff] }
 0x8c8   : > { %v2462_v22 = vpack.c.bf16 %v1499_v19, %v1498_v18 }
 0x8cd   : > { %v2605_v26 = vpop.eup %2604 }
 0x8ce   : > { %v1134_v27 = vmul.f32 %v2605_v26, %v3317_v62  ;;  %v2416_v62 = vpack.c.bf16 %v1477_v36, %v1476_v14  ;;  %v1485_v26 = vld [vmem:[#allocation13 + $0xc8] sm:$0xff] }
 0x8cf   : > { %v1501_v14 = vld [vmem:[#allocation13 + $0x148] sm:$0xff] }
 0x8d0   : > { %v1140_v29 = vmul.f32 %v1139_v25, %v1134_v27  ;;  %2417 = vmatprep.subr.bf16.mxu1 %v2416_v62  ;;  %v1516_v27 = vld [vmem:[#allocation13 + $0x1c0] sm:$0xff]  ;;  %v1487_v62 = vld [vmem:[#allocation13 + $0xd8] sm:$0xff] }
 0x8d1   : > { %v2607_v32 = vpop.eup %2606  ;;  %v2436_v37 = vpack.c.bf16 %v1487_v62, %v1486_v21 }
 0x8d2   : > { %v1146_v33 = vadd.f32 %v1145_v28, %v1140_v29  ;;  %v1135_v34 = vmul.f32 %v2607_v32, %v3321_v3  ;;  %v2450_v3 = vpack.c.bf16 %v1493_v44, %v1492_v43  ;;  %v1517_v29 = vld [vmem:[#allocation13 + $0x1c8] sm:$0xff]  ;;  %v1468_v32 = vld [vmem:[#allocation13 + $0x40] sm:$0xff]  ;;  %v2468_v43 = vpack.c.bf16 %v1519_v39, %v1518_v23 }
 0x8d4   : > { %1299 = vmatmul.mubr.f32.vlgmr.msra.gmra.mrb[6].mxu1 %v1146_v33  ;;  %1376 = vmatmul.mubr.f32.vlgmr.msra.gmra.mrb[8].mxu0 %v1146_v33  ;;  %v1141_v35 = vmul.f32 %v1139_v25, %v1135_v34  ;;  %v1484_v25 = vld [vmem:[#allocation13 + $0xc0] sm:$0xff]  ;;  %v1469_v33 = vld [vmem:[#allocation13 + $0x48] sm:$0xff]  ;;  %v2464_v34 = vpack.c.bf16 %v1517_v29, %v1516_v27 }
 0x8d5   : > { %1304 = vmatprep.mubr.f32.mxu1 %v2915_v38  ;;  %1381 = vmatprep.mubr.f32.mxu0 %v2915_v38  ;;  %v1511_v38 = vld [vmem:[#allocation13 + $0x198] sm:$0xff] }
 0x8d6   : > { %v1147_v12 = vadd.f32 %v1145_v28, %v1141_v35  ;;  %2419 = vmatpush3.bf16.msra.mxu1 %v2418_v41  ;;  %2451 = vmatpush3.bf16.msra.mxu0 %v2450_v3  ;;  %v2452_v42 = vpack.c.bf16 %v1511_v38, %v1510_v47  ;;  %v2432_v28 = vpack.c.bf16 %v1485_v26, %v1484_v25  ;;  %v1471_v41 = vld [vmem:[#allocation13 + $0x58] sm:$0xff]  ;;  %v1502_v3 = vld [vmem:[#allocation13 + $0x150] sm:$0xff]  ;;  %v1488_v47 = vld [vmem:[#allocation13 + $0xe0] sm:$0xff] }
 0x8d7   : > { %2421 = vmatprep.subr.bf16.mxu1 %v2420_v48  ;;  %v2434_v35 = vpack.c.bf16 %v1469_v33, %v1468_v32  ;;  %v2438_v44 = vpack.c.bf16 %v1471_v41, %v1470_v40  ;;  %v2470_v46 = vpack.c.bf16 %v1503_v45, %v1502_v3  ;;  %v1489_v48 = vld [vmem:[#allocation13 + $0xe8] sm:$0xff]  ;;  %v1520_v38 = vld [vmem:[#allocation13 + $0x1e0] sm:$0xff] }
 0x8d8   : > { %1305 = vmatmul.mubr.f32.gmra.mrb[8].mxu1 %v1147_v12  ;;  %1382 = vmatmul.mubr.f32.gmra.mrb[10].mxu0 %v1147_v12  ;;  %v1500_v12 = vld [vmem:[#allocation13 + $0x140] sm:$0xff]  ;;  %v2440_v49 = vpack.c.bf16 %v1489_v48, %v1488_v47  ;;  %v2472_v52 = vpack.c.bf16 %v1521_v50, %v1520_v38 }
 0x8d9   : > { %2453 = vmatprep.subr.bf16.mxu0 %v2452_v42  ;;  %v2466_v36 = vpack.c.bf16 %v1501_v14, %v1500_v12  ;;  %v1472_v42 = vld [vmem:[#allocation13 + $0x60] sm:$0xff] }
 0x8da   : > { %2423 = vmatpush3.bf16.msra.mxu1 %v2422_v51  ;;  %2455 = vmatpush3.bf16.msra.mxu0 %v2454_v54  ;;  %v1473_v51 = vld [vmem:[#allocation13 + $0x68] sm:$0xff]  ;;  %v1504_v54 = vld [vmem:[#allocation13 + $0x160] sm:$0xff] }
 0x8db   : > { %2425 = vmatprep.subr.bf16.mxu1 %v2424_v58  ;;  %2457 = vmatprep.subr.bf16.mxu0 %v2456_v63  ;;  %v2442_v53 = vpack.c.bf16 %v1473_v51, %v1472_v42  ;;  %v2474_v56 = vpack.c.bf16 %v1505_v55, %v1504_v54  ;;  %v1491_v58 = vld [vmem:[#allocation13 + $0xf8] sm:$0xff]  ;;  %v1474_v63 = vld [vmem:[#allocation13 + $0x70] sm:$0xff] }
 0x8dc   : > { %v2444_v60 = vpack.c.bf16 %v1491_v58, %v1490_v57 }
 0x8de   : > { %2427 = vmatpush3.bf16.msra.mxu1 %v2426_v1  ;;  %2459 = vmatpush3.bf16.msra.mxu0 %v2458_v5  ;;  %v1475_v1 = vld [vmem:[#allocation13 + $0x78] sm:$0xff]  ;;  %v1506_v5 = vld [vmem:[#allocation13 + $0x170] sm:$0xff] }
 0x8df   : > { %2429 = vmatprep.subr.bf16.mxu1 %v2428_v9  ;;  %2461 = vmatprep.subr.bf16.mxu0 %v2460_v16  ;;  %v2446_v4 = vpack.c.bf16 %v1475_v1, %v1474_v63  ;;  %v2478_v7 = vpack.c.bf16 %v1507_v6, %v1506_v5  ;;  %v1217_v9 = vrot.slane %v1212_v8, %v3260_v13 }
 0x8e2   : > { %2431 = vmatpush3.bf16.msra.mxu1 %v2430_v17  ;;  %2463 = vmatpush3.bf16.msra.mxu0 %v2462_v22 }
 0x8e3   : > { %2433 = vmatprep.subr.bf16.mxu1 %v2432_v28  ;;  %2465 = vmatprep.subr.bf16.mxu0 %v2464_v34 }
 0x8e6   : > { %2435 = vmatpush3.bf16.msra.mxu1 %v2434_v35  ;;  %2467 = vmatpush3.bf16.msra.mxu0 %v2466_v36 }
 0x8e7   : > { %2437 = vmatprep.subr.bf16.mxu1 %v2436_v37  ;;  %2469 = vmatprep.subr.bf16.mxu0 %v2468_v43 }
 0x8ea   : > { %2439 = vmatpush3.bf16.msra.mxu1 %v2438_v44  ;;  %2471 = vmatpush3.bf16.msra.mxu0 %v2470_v46 }
 0x8eb   : > { %2441 = vmatprep.subr.bf16.mxu1 %v2440_v49  ;;  %2473 = vmatprep.subr.bf16.mxu0 %v2472_v52 }
 0x8ee   : > { %2443 = vmatpush3.bf16.msra.mxu1 %v2442_v53  ;;  %2475 = vmatpush3.bf16.msra.mxu0 %v2474_v56 }
 0x8ef   : > { %2445 = vmatprep.subr.bf16.mxu1 %v2444_v60  ;;  %2477 = vmatprep.subr.bf16.mxu0 %v2476_v2 }
 0x8f2   : > { %2447 = vmatpush3.bf16.msra.mxu1 %v2446_v4  ;;  %2479 = vmatpush3.bf16.msra.mxu0 %v2478_v7 }
 0x9a7   : > { %v1300_v16 = vpop.f32.mrb[6].mxu1  ;;  %v1377_v17 = vpop.f32.mrb[8].mxu0 }
 0x9a8   : > { %v3340_v18 = vadd.f32 %v1300_v16, %v1217_v9  ;;  %v3342_v19 = vadd.f32 %v1377_v17, %v1225_v10  ;;  %v1302_v22 = vpop.f32.mrb[7].mxu1  ;;  %v1379_v25 = vpop.f32.mrb[9].mxu0 }
 0x9a9   : > { %v3344_v26 = vadd.f32 %v1302_v22, %v1221_v11  ;;  %v3346_v27 = vadd.f32 %v1379_v25, %v1229_v15 }
 0x9aa   : > { %v1388_v13 = vmul.f32 %v3340_v18, %v3340_v18  ;;  %v1390_v28 = vmul.f32 %v3342_v19, %v3342_v19 }
 0x9ab   : > { %v1389_v29 = vmul.f32 %v3344_v26, %v3344_v26  ;;  %v1391_v32 = vmul.f32 %v3346_v27, %v3346_v27  ;;  %v1306_v33 = vpop.f32.mrb[8].mxu1  ;;  %v1383_v34 = vpop.f32.mrb[10].mxu0 }
 0x9ac   : > { %v1396_v35 = vmul.f32 %v1388_v13, %v3340_v18  ;;  %v1398_v12 = vmul.f32 %v1390_v28, %v3342_v19  ;;  %v3358_v14 = vadd.f32 %v1306_v33, %v1217_v9  ;;  %v3360_v36 = vadd.f32 %v1383_v34, %v1225_v10  ;;  %v1308_v21 = vpop.f32.mrb[9].mxu1  ;;  %v1385_v62 = vpop.f32.mrb[11].mxu0 }
 0x9ad   : > { %v1397_v23 = vmul.f32 %v1389_v29, %v3344_v26  ;;  %v1399_v37 = vmul.f32 %v1391_v32, %v3346_v27  ;;  %v3364_v39 = vadd.f32 %v1308_v21, %v1221_v11  ;;  %v3366_v40 = vadd.f32 %v1385_v62, %v1229_v15 }
 0x9ae   : > { %v1404_v41 = vmul.f32 0.044715, %v1396_v35  ;;  %v1406_v43 = vmul.f32 0.044715, %v1398_v12  ;;  %v1392_v44 = vmul.f32 %v3358_v14, %v3358_v14  ;;  %v1394_v3 = vmul.f32 %v3360_v36, %v3360_v36 }
 0x9af   : > { %v1405_v45 = vmul.f32 0.044715, %v1397_v23  ;;  %v1407_v46 = vmul.f32 0.044715, %v1399_v37  ;;  %v1393_v47 = vmul.f32 %v3364_v39, %v3364_v39  ;;  %v1395_v48 = vmul.f32 %v3366_v40, %v3366_v40 }
 0x9b0   : > { %v1412_v38 = vadd.f32 %v1404_v41, %v3340_v18  ;;  %v1414_v49 = vadd.f32 %v1406_v43, %v3342_v19  ;;  %v1400_v50 = vmul.f32 %v1392_v44, %v3358_v14  ;;  %v1402_v42 = vmul.f32 %v1394_v3, %v3360_v36 }
 0x9b1   : > { %v1413_v51 = vadd.f32 %v1405_v45, %v3344_v26  ;;  %v1415_v52 = vadd.f32 %v1407_v46, %v3346_v27  ;;  %v1401_v53 = vmul.f32 %v1393_v47, %v3364_v39  ;;  %v1403_v54 = vmul.f32 %v1395_v48, %v3366_v40 }
 0x9b2   : > { %v1420_v55 = vmul.f32 0.7978846, %v1412_v38  ;;  %v1422_v56 = vmul.f32 0.7978846, %v1414_v49  ;;  %v1408_v57 = vmul.f32 0.044715, %v1400_v50 }
 0x9b3   : > { %v1421_v58 = vmul.f32 0.7978846, %v1413_v51  ;;  %v1423_v59 = vmul.f32 0.7978846, %v1415_v52  ;;  %v1410_v60 = vmul.f32 0.044715, %v1402_v42 }
 0x9b4   : > { %2608 = vtanh.f32 %v1420_v55  ;;  %v1416_v61 = vadd.f32 %v1408_v57, %v3358_v14  ;;  %v1409_v63 = vmul.f32 0.044715, %v1401_v53  ;;  %v1411_v1 = vmul.f32 0.044715, %v1403_v54 }
 0x9b5   : > { %2610 = vtanh.f32 %v1422_v56  ;;  %v1418_v2 = vadd.f32 %v1410_v60, %v3360_v36 }
 0x9b6   : > { %v1424_v4 = vmul.f32 0.7978846, %v1416_v61  ;;  %v1417_v5 = vadd.f32 %v1409_v63, %v3364_v39  ;;  %v1419_v6 = vadd.f32 %v1411_v1, %v3366_v40  ;;  %2612 = vtanh.f32 %v1421_v58 }
 0x9b7   : > { %v1426_v7 = vmul.f32 0.7978846, %v1418_v2  ;;  %2614 = vtanh.f32 %v1423_v59 }
 0x9b8   : > { %v1425_v8 = vmul.f32 0.7978846, %v1417_v5  ;;  %v1427_v9 = vmul.f32 0.7978846, %v1419_v6  ;;  %2616 = vtanh.f32 %v1424_v4 }
 0x9b9   : > { %2618 = vtanh.f32 %v1426_v7 }
 0x9ba   : > { %2620 = vtanh.f32 %v1425_v8 }
 0x9bb   : > { %2622 = vtanh.f32 %v1427_v9 }
 0x9be   : > { %v2609_v10 = vpop.eup %2608 }
 0x9bf   : > { %v2611_v11 = vpop.eup %2610  ;;  %v1436_v15 = vadd.f32 1.0, %v2609_v10 }
 0x9c0   : > { %v2613_v16 = vpop.eup %2612  ;;  %v1438_v17 = vadd.f32 1.0, %v2611_v11 }
 0x9c1   : > { %v2615_v22 = vpop.eup %2614  ;;  %v1437_v25 = vadd.f32 1.0, %v2613_v16  ;;  %v1444_v28 = vmul.f32 0.5, %v1436_v15 }
 0x9c2   : > { %v2617_v13 = vpop.eup %2616  ;;  %v1439_v29 = vadd.f32 1.0, %v2615_v22  ;;  %v1446_v33 = vmul.f32 0.5, %v1438_v17 }
 0x9c3   : > { %v2619_v32 = vpop.eup %2618  ;;  %v1445_v34 = vmul.f32 0.5, %v1437_v25  ;;  %v1440_v35 = vadd.f32 1.0, %v2617_v13  ;;  %v1452_v43 = vmul.f32 %v1444_v28, %v3340_v18 }
 0x9c4   : > { %v2621_v12 = vpop.eup %2620  ;;  %v1447_v21 = vmul.f32 0.5, %v1439_v29  ;;  %v1442_v62 = vadd.f32 1.0, %v2619_v32  ;;  %v1454_v46 = vmul.f32 %v1446_v33, %v3342_v19 }
 0x9c5   : > { %v2623_v23 = vpop.eup %2622  ;;  %v1453_v37 = vmul.f32 %v1445_v34, %v3344_v26  ;;  %v1441_v41 = vadd.f32 1.0, %v2621_v12  ;;  %v1448_v45 = vmul.f32 0.5, %v1440_v35 }
 0x9c6   : > { %v1455_v44 = vmul.f32 %v1447_v21, %v3346_v27  ;;  %v1443_v3 = vadd.f32 1.0, %v2623_v23  ;;  %v1450_v48 = vmul.f32 0.5, %v1442_v62 }
 0x9c7   : > { %1588 = vmatprep.mubr.f32.mxu1 %v1453_v37  ;;  %v1449_v47 = vmul.f32 0.5, %v1441_v41  ;;  %v1456_v50 = vmul.f32 %v1448_v45, %v3358_v14  ;;  %v1676_v14 = vrot.slane %v3326_v24, %v3283_v30  ;;  %v1692_v30 = vrot.slane %v3326_v24, %v3286_v31 }
 0x9c8   : > { %1662 = vmatprep.mubr.f32.mxu0 %v1455_v44  ;;  %1589 = vmatmul.mubr.f32.vlgmr.msra.gmra.mrb[10].mxu1 %v1452_v43  ;;  %v1451_v38 = vmul.f32 0.5, %v1443_v3  ;;  %v1458_v18 = vmul.f32 %v1450_v48, %v3360_v36 }
 0x9c9   : > { %1663 = vmatmul.mubr.f32.vlgmr.msra.gmra.mrb[12].mxu0 %v1454_v46  ;;  %v1457_v49 = vmul.f32 %v1449_v47, %v3364_v39 }
 0x9ca   : > { %v1459_v26 = vmul.f32 %v1451_v38, %v3366_v40 }
 0x9cb   : > { %1593 = vmatprep.mubr.f32.mxu1 %v1457_v49 }
 0x9cc   : > { %1667 = vmatprep.mubr.f32.mxu0 %v1459_v26  ;;  %1594 = vmatmul.mubr.f32.gmra.mrb[12].mxu1 %v1456_v50 }
 0x9cd   : > { %1668 = vmatmul.mubr.f32.gmra.mrb[14].mxu0 %v1458_v18 }
 0xa9b   : > { %v1991_v19 = vpop.f32.mrb[10].mxu1 }
 0xa9c   : > { %v2029_v27 = vpop.f32.mrb[12].mxu0  ;;  %v1992_v42 = vpop.f32.mrb[11].mxu1 }
 0xa9d   : > { %v1993_v51 = vadd.f32 %v1992_v42, %v1991_v19  ;;  %v2030_v52 = vpop.f32.mrb[13].mxu0 }
 0xa9e   : > { %v2031_v53 = vadd.f32 %v2030_v52, %v2029_v27 }
 0xa9f   : > { %v1994_v54 = vpop.f32.mrb[12].mxu1 }
 0xaa0   : > { %v1665_v55 = vadd.f32 %v2031_v53, %v1993_v51  ;;  %v2032_v56 = vpop.f32.mrb[14].mxu0  ;;  %v1995_v39 = vpop.f32.mrb[13].mxu1 }
 0xaa1   : > { %v2033_v40 = vpop.f32.mrb[15].mxu0 }
 0xaa2   : > { %v1672_v36 = vadd.f32 %v1665_v55, %v3313_v20  ;;  %v1697_v20 = vrot.slane %v3326_v24, %v3296_v0 }
 0xaa4   : > { %v1677_v57 = vadd.f32 %v1676_v14, %v1672_v36 }
 0xaa6   : > { %1678 = vadd.xlane.f32.xlu0 %v1677_v57 }
 0xb33   : > { %v1679_v58 = vpop.xlane.xlu0 %1678 }
 0xb34   : > { %v1680_v59 = vmul.f32 0.0078125, %v1679_v58 }
 0xb36   : > { %v1681_v60 = vsub.f32 %v1677_v57, %v1680_v59 }
 0xb38   : > { %v1682_v61 = vmul.f32 %v1681_v60, %v1681_v60 }
 0xb3a   : > { %1683 = vadd.xlane.f32.xlu1 %v1682_v61 }
 0xbc7   : > { %v1684_v63 = vpop.xlane.xlu1 %1683 }
 0xbc8   : > { %v1685_v1 = vmul.f32 0.0078125, %v1684_v63 }
 0xbca   : > { %v1686_v2 = vadd.f32 1e-06, %v1685_v1 }
 0xbcc   : > { %2624 = vrsqrt.f32 %v1686_v2 }
 0xbd6   : > { %v2625_v4 = vpop.eup %2624 }
 0xbd7   : > { %v1688_v5 = vmul.f32 %v2625_v4, %v1681_v60 }
 0xbd9   : > { %v1693_v6 = vmul.f32 %v1692_v30, %v1688_v5 }
 0xbdb   : > { %v1698_v7 = vadd.f32 %v1697_v20, %v1693_v6 }
 0xbdd   : > { %1699 = vst [vmem:[%s410_s25] sm:$0xff] %v1698_v7 }
 0xbde   : > { %2837 = shalt.err (!%p2834_p8)
}
 0xbdf   : > { %s2838_s22 = scalar_lea.hbm %s3408_s19, 128  ;;  %s2842_s9 = scalar_lea.hbm %s3460_s8, 256 }
 0xbe0   : > { %p2839_p4 = scmp.ne.s32.totalorder %s3408_s19, %s2838_s22  ;;  %p2843_p3 = scmp.lt.u32.totalorder %s3408_s19, %s3460_s8 }
 0xbe1   : > { %p2844_p5 = scmp.lt.u32.totalorder %s2842_s9, %s2838_s22  ;;  %p2846_p6 = scmp.lt.u32.totalorder %s2838_s22, %s3408_s19 }
 0xbe2   : > { %p2840_p10 = pnand %p2839_p4, %p3490_p9 }
 0xbe3   : > { %p2845_p7 = por %p2844_p5, %p2843_p3 }
 0xbe4   : > { %p2841_p11 = pneg %p2840_p10 }
 0xbe5   : > { %p2847_p12 = por %p2846_p6, %p2845_p7 }
 0xbe7   : > { %p2848_p1 = pnand %p2847_p12, %p2841_p11 }
 0xbe9   : > { %2851 = shalt.err (!%p2848_p1)
}
 0xbea   : > { %2506 = dma.vmem_to_hbm [thread:$0]  (%p3490_p9), %s3410_s15, 128, %s3408_s19, %s1701_s20  }
 0xbeb PF: > { %s1726_s25 = sand.u32 1, %s2890_s27   ;;  %p3491_p13 = scmp.ne.s32.totalorder %s3481_s18, 0 }
 0xbec   : > { %p3492_p0 = scmp.ge.s32.totalorder %s2902_s30, 2  ;;  %s1727_s21 = scalar_lea.sflag [#allocation4], %s1726_s25 }
 0xbee   : > { %p2532_p2 = pnand %p3492_p0, %p3491_p13 }
 0xbf0   : > { %2885 = dma.done.wait (!%p2532_p2), %s1727_s21, 128  }
 0xbf1   : > { %2887 = vsyncadd (!%p2532_p2), %s1727_s21, 4294967168  ;;  %p24_p8 = scmp.ge.s32.totalorder %s3153_s23, 4   ;;  %s3493_s27 = smov %s2894_s28 }
 0xbf2   : > { %s3494_s28 = smov %s2898_s29  ;;  %s3495_s29 = smov %s3164_s17 }
 0xbf3   : > { %s3496_s30 = smov %s3153_s23  ;;  %26 = sbr.rel (!%p24_p8) target bundleno = 11 (0xb), region = 124 }
 0xbfa   :  { %1732 = vsyncpa [#allocation3], 1 }
 0xbfb   :  { %1734 = vsyncpa [#allocation3 + $0x1], 1 }
 0xbfc   :  { %1735 = vsyncpa [#allocation6], 1 }
 0xbfd   :  { %1736 = vsyncpa [#allocation9], 1 }
 0xbfe   :  { %1737 = vsyncpa [#allocation12], 1 }
 0xbff   :  { %1738 = vsyncpa [#allocation4], 1 }
 0xc00   :  { %1740 = vsyncpa [#allocation4 + $0x1], 1 }

</bundles_post_ra>
